<compile_context>
chip_gen: v7x
topology: tpu7x:2x2x1
jax: 0.10.0
libtpu: 0.0.40
codegen_flags: <defaults>
</compile_context>

<pallas_src>
import jax
import jax.numpy as jnp
from jax.experimental import pallas as pl
from jax.experimental.pallas import tpu as pltpu


# ---------------------------------------------------------------------------
# Fused Pallas kernel: entire forward pass in one invocation.
# ---------------------------------------------------------------------------
def _fused_forward_kernel(
    solute_ref, solvent_ref, adj_u_ref, adj_v_ref,
    gc1_w_ref, gc1_b_ref, gc2_w_ref, gc2_b_ref,
    fc1_w_ref, fc1_b_ref, fc2_w_ref, fc2_b_ref,
    fc3_w_ref, fc3_b_ref, fc4_w_ref, fc4_b_ref,
    out_ref,
):
    f32 = jnp.float32

    gc1_w = gc1_w_ref[...]          # (Fin, H)
    gc1_b = gc1_b_ref[...]          # (1, H)
    gc2_w = gc2_w_ref[...]          # (H, C)
    gc2_b = gc2_b_ref[...]          # (1, C)

    def gcn_branch(x, adj):
        # x: (B, N, Fin), adj: (B, N, N)
        B, N, Fin = x.shape
        H = gc1_w.shape[1]
        C = gc2_w.shape[1]
        # gc1: relu(A @ (X @ W1) + b1). X@W1 as one (B*N, Fin) MXU matmul.
        xw = jnp.dot(x.reshape(B * N, Fin), gc1_w,
                     preferred_element_type=f32).reshape(B, N, H)
        h = jnp.einsum("bij,bjh->bih", adj, xw, preferred_element_type=f32)
        h = jnp.maximum(h + gc1_b, 0.0)                       # (B, N, H)
        # gc2: A @ (X @ W2) + b2  (no relu).
        hw = jnp.dot(h.reshape(B * N, H), gc2_w,
                     preferred_element_type=f32).reshape(B, N, C)
        out = jnp.einsum("bij,bjc->bic", adj, hw, preferred_element_type=f32)
        return out + gc2_b                                     # (B, N, C)

    s = gcn_branch(solute_ref[...], adj_u_ref[...])            # (B, Nu, C)
    v = gcn_branch(solvent_ref[...], adj_v_ref[...])           # (B, Nv, C)

    # torch.cat(dim=1) + view(B, -1): row-major per-sample flatten, built as a
    # lane-axis concatenation of per-node (B, C) slabs (VMEM-only, no HBM).
    Nu = s.shape[1]
    Nv = v.shape[1]
    pieces = [s[:, n, :] for n in range(Nu)] + [v[:, n, :] for n in range(Nv)]
    data = jnp.concatenate(pieces, axis=-1)                    # (B, (Nu+Nv)*C)

    def dense(x, w_ref, b_ref, relu):
        y = jnp.dot(x, w_ref[...], preferred_element_type=f32) + b_ref[...]
        return jnp.maximum(y, 0.0) if relu else y

    data = dense(data, fc1_w_ref, fc1_b_ref, True)
    data = dense(data, fc2_w_ref, fc2_b_ref, True)
    data = dense(data, fc3_w_ref, fc3_b_ref, True)
    data = dense(data, fc4_w_ref, fc4_b_ref, False)            # (B, 1)
    out_ref[...] = data.astype(out_ref.dtype)


# ---------------------------------------------------------------------------
# Wrapper: one pallas_call, everything resident in VMEM, no grid.
# ---------------------------------------------------------------------------
def my_new_gcn_forward(params, solute, solvent, solute_adj, solvent_adj):
    p = params
    B = solute.shape[0]
    args = (
        solute, solvent, solute_adj, solvent_adj,
        p["gc1_w"], p["gc1_b"], p["gc2_w"], p["gc2_b"],
        p["fc1_w"], p["fc1_b"], p["fc2_w"], p["fc2_b"],
        p["fc3_w"], p["fc3_b"], p["fc4_w"], p["fc4_b"],
    )
    vmem = lambda: pl.BlockSpec(memory_space=pltpu.MemorySpace.VMEM)
    return pl.pallas_call(
        _fused_forward_kernel,
        out_shape=jax.ShapeDtypeStruct((B, 1), jnp.float32),
        in_specs=[vmem() for _ in args],
        out_specs=vmem(),
    )(*args)


# ---------------------------------------------------------------------------
# Parameters (torch-style init, Linear weights stored pre-transposed (in,out))
# ---------------------------------------------------------------------------
def init_params(key, nfeat, nhid, nclass, solute_solvent_size):
    ks = jax.random.split(key, 12)

    def uniform(k, shape, fan_in):
        bound = 1.0 / jnp.sqrt(jnp.float32(fan_in))
        return jax.random.uniform(k, shape, jnp.float32, -bound, bound)

    return {
        "gc1_w": uniform(ks[0], (nfeat, nhid), nfeat),
        "gc1_b": uniform(ks[1], (1, nhid), nfeat),
        "gc2_w": uniform(ks[2], (nhid, nclass), nhid),
        "gc2_b": uniform(ks[3], (1, nclass), nhid),
        "fc1_w": uniform(ks[4], (solute_solvent_size * 16, 360), solute_solvent_size * 16),
        "fc1_b": uniform(ks[5], (1, 360), solute_solvent_size * 16),
        "fc2_w": uniform(ks[6], (360, 256), 360),
        "fc2_b": uniform(ks[7], (1, 256), 360),
        "fc3_w": uniform(ks[8], (256, 128), 256),
        "fc3_b": uniform(ks[9], (1, 128), 256),
        "fc4_w": uniform(ks[10], (128, 1), 128),
        "fc4_b": uniform(ks[11], (1, 1), 128),
    }


def reference_forward(params, solute, solvent, solute_adj, solvent_adj):
    """Pure-JAX reference (PyTorch contraction order) for correctness."""
    p = params

    def gcn(x, a, w, b, relu):
        out = jnp.einsum("bij,bjk->bik", a, jnp.einsum("bnf,fo->bno", x, w)) + b[0]
        return jnp.maximum(out, 0.0) if relu else out

    s = gcn(solute, solute_adj, p["gc1_w"], p["gc1_b"], True)
    s = gcn(s, solute_adj, p["gc2_w"], p["gc2_b"], False)
    v = gcn(solvent, solvent_adj, p["gc1_w"], p["gc1_b"], True)
    v = gcn(v, solvent_adj, p["gc2_w"], p["gc2_b"], False)
    data = jnp.concatenate([s, v], axis=1).reshape(solute.shape[0], -1)
    for name, relu in (("fc1", True), ("fc2", True), ("fc3", True), ("fc4", False)):
        data = data @ p[name + "_w"] + p[name + "_b"][0]
        if relu:
            data = jnp.maximum(data, 0.0)
    return data


# ---------------------------------------------------------------------------
if __name__ == "__main__":
    # Small, self-consistent shapes:
    #   nclass must be 16 so that flatten == solute_solvent_size * 16.
    B = 2
    N_SOLUTE, N_SOLVENT = 8, 8
    SOLUTE_SOLVENT_SIZE = N_SOLUTE + N_SOLVENT          # 16
    NFEAT, NHID, NCLASS = 4, 32, 16

    key = jax.random.PRNGKey(0)
    k_param, k_su, k_sv, k_au, k_av = jax.random.split(key, 5)

    params = init_params(k_param, NFEAT, NHID, NCLASS, SOLUTE_SOLVENT_SIZE)

    solute = jax.random.normal(k_su, (B, N_SOLUTE, NFEAT), jnp.float32)
    solvent = jax.random.normal(k_sv, (B, N_SOLVENT, NFEAT), jnp.float32)
    a_u = jax.random.uniform(k_au, (B, N_SOLUTE, N_SOLUTE), jnp.float32)
    a_v = jax.random.uniform(k_av, (B, N_SOLVENT, N_SOLVENT), jnp.float32)
    solute_adj = 0.5 * (a_u + jnp.swapaxes(a_u, 1, 2)) + jnp.eye(N_SOLUTE)
    solvent_adj = 0.5 * (a_v + jnp.swapaxes(a_v, 1, 2)) + jnp.eye(N_SOLVENT)

    fwd = jax.jit(my_new_gcn_forward)
    out = fwd(params, solute, solvent, solute_adj, solvent_adj)
    out = jax.block_until_ready(out)

    ref = reference_forward(params, solute, solvent, solute_adj, solvent_adj)
    assert out.shape == (B, 1), out.shape
    assert jnp.allclose(out, ref, atol=1e-4, rtol=1e-4), "mismatch vs JAX reference"

    print("KERNEL_OK")
</pallas_src>

<mosaic_0001>
module attributes {stable_mosaic.version = 11 : i64} {
  func.func @_fused_forward_kernel(%arg0: memref<2x8x4xf32, #tpu.memory_space<vmem>>, %arg1: memref<2x8x4xf32, #tpu.memory_space<vmem>>, %arg2: memref<2x8x8xf32, #tpu.memory_space<vmem>>, %arg3: memref<2x8x8xf32, #tpu.memory_space<vmem>>, %arg4: memref<4x32xf32, #tpu.memory_space<vmem>>, %arg5: memref<1x32xf32, #tpu.memory_space<vmem>>, %arg6: memref<32x16xf32, #tpu.memory_space<vmem>>, %arg7: memref<1x16xf32, #tpu.memory_space<vmem>>, %arg8: memref<256x360xf32, #tpu.memory_space<vmem>>, %arg9: memref<1x360xf32, #tpu.memory_space<vmem>>, %arg10: memref<360x256xf32, #tpu.memory_space<vmem>>, %arg11: memref<1x256xf32, #tpu.memory_space<vmem>>, %arg12: memref<256x128xf32, #tpu.memory_space<vmem>>, %arg13: memref<1x128xf32, #tpu.memory_space<vmem>>, %arg14: memref<128x1xf32, #tpu.memory_space<vmem>>, %arg15: memref<1x1xf32, #tpu.memory_space<vmem>>, %arg16: memref<2x1xf32, #tpu.memory_space<vmem>>) attributes {dimension_semantics = [], scalar_prefetch = 0 : i64, scratch_operands = 0 : i64, tpu.core_type = #tpu.core_type<tc>} {
    %c0 = arith.constant 0 : index
    %c0_0 = arith.constant 0 : index
    %0 = vector.load %arg4[%c0, %c0_0] : memref<4x32xf32, #tpu.memory_space<vmem>>, vector<4x32xf32>
    %c0_1 = arith.constant 0 : index
    %c0_2 = arith.constant 0 : index
    %1 = vector.load %arg5[%c0_1, %c0_2] : memref<1x32xf32, #tpu.memory_space<vmem>>, vector<1x32xf32>
    %c0_3 = arith.constant 0 : index
    %c0_4 = arith.constant 0 : index
    %2 = vector.load %arg6[%c0_3, %c0_4] : memref<32x16xf32, #tpu.memory_space<vmem>>, vector<32x16xf32>
    %c0_5 = arith.constant 0 : index
    %c0_6 = arith.constant 0 : index
    %3 = vector.load %arg7[%c0_5, %c0_6] : memref<1x16xf32, #tpu.memory_space<vmem>>, vector<1x16xf32>
    %c0_7 = arith.constant 0 : index
    %c0_8 = arith.constant 0 : index
    %c0_9 = arith.constant 0 : index
    %4 = vector.load %arg0[%c0_7, %c0_8, %c0_9] : memref<2x8x4xf32, #tpu.memory_space<vmem>>, vector<2x8x4xf32>
    %c0_10 = arith.constant 0 : index
    %c0_11 = arith.constant 0 : index
    %c0_12 = arith.constant 0 : index
    %5 = vector.load %arg2[%c0_10, %c0_11, %c0_12] : memref<2x8x8xf32, #tpu.memory_space<vmem>>, vector<2x8x8xf32>
    %6 = vector.shape_cast %4 : vector<2x8x4xf32> to vector<16x4xf32>
    %cst = arith.constant dense<0.000000e+00> : vector<16x32xf32>
    %7 = tpu.matmul %6, %0, %cst {dimension_numbers = #tpu.dot_dimension_numbers<[1], [0], [0], [1], [0, 0, 1, 1], [], []>} : vector<16x4xf32>, vector<4x32xf32>, vector<16x32xf32> -> vector<16x32xf32>
    %8 = vector.shape_cast %7 : vector<16x32xf32> to vector<2x8x32xf32>
    "tpu.trace_start"() <{level = 10 : i32, message = "bij,bjh->bih"}> : () -> ()
    %cst_13 = arith.constant dense<0.000000e+00> : vector<2x8x32xf32>
    %9 = tpu.matmul %5, %8, %cst_13 {dimension_numbers = #tpu.dot_dimension_numbers<[2], [1], [1], [2], [0, 0, 0, 1, 1, 2], [0], [0]>} : vector<2x8x8xf32>, vector<2x8x32xf32>, vector<2x8x32xf32> -> vector<2x8x32xf32>
    "tpu.trace_stop"() : () -> ()
    %10 = vector.shape_cast %1 : vector<1x32xf32> to vector<1x1x32xf32>
    %11 = vector.broadcast %10 : vector<1x1x32xf32> to vector<2x8x32xf32>
    %12 = arith.addf %9, %11 : vector<2x8x32xf32>
    %cst_14 = arith.constant 0.000000e+00 : f32
    %13 = vector.broadcast %cst_14 : f32 to vector<2x8x32xf32>
    %14 = arith.maximumf %12, %13 : vector<2x8x32xf32>
    %15 = vector.shape_cast %14 : vector<2x8x32xf32> to vector<16x32xf32>
    %cst_15 = arith.constant dense<0.000000e+00> : vector<16x16xf32>
    %16 = tpu.matmul %15, %2, %cst_15 {dimension_numbers = #tpu.dot_dimension_numbers<[1], [0], [0], [1], [0, 0, 1, 1], [], []>} : vector<16x32xf32>, vector<32x16xf32>, vector<16x16xf32> -> vector<16x16xf32>
    %17 = vector.shape_cast %16 : vector<16x16xf32> to vector<2x8x16xf32>
    "tpu.trace_start"() <{level = 10 : i32, message = "bij,bjc->bic"}> : () -> ()
    %cst_16 = arith.constant dense<0.000000e+00> : vector<2x8x16xf32>
    %18 = tpu.matmul %5, %17, %cst_16 {dimension_numbers = #tpu.dot_dimension_numbers<[2], [1], [1], [2], [0, 0, 0, 1, 1, 2], [0], [0]>} : vector<2x8x8xf32>, vector<2x8x16xf32>, vector<2x8x16xf32> -> vector<2x8x16xf32>
    "tpu.trace_stop"() : () -> ()
    %19 = vector.shape_cast %3 : vector<1x16xf32> to vector<1x1x16xf32>
    %20 = vector.broadcast %19 : vector<1x1x16xf32> to vector<2x8x16xf32>
    %21 = arith.addf %18, %20 : vector<2x8x16xf32>
    %c0_17 = arith.constant 0 : index
    %c0_18 = arith.constant 0 : index
    %c0_19 = arith.constant 0 : index
    %22 = vector.load %arg1[%c0_17, %c0_18, %c0_19] : memref<2x8x4xf32, #tpu.memory_space<vmem>>, vector<2x8x4xf32>
    %c0_20 = arith.constant 0 : index
    %c0_21 = arith.constant 0 : index
    %c0_22 = arith.constant 0 : index
    %23 = vector.load %arg3[%c0_20, %c0_21, %c0_22] : memref<2x8x8xf32, #tpu.memory_space<vmem>>, vector<2x8x8xf32>
    %24 = vector.shape_cast %22 : vector<2x8x4xf32> to vector<16x4xf32>
    %cst_23 = arith.constant dense<0.000000e+00> : vector<16x32xf32>
    %25 = tpu.matmul %24, %0, %cst_23 {dimension_numbers = #tpu.dot_dimension_numbers<[1], [0], [0], [1], [0, 0, 1, 1], [], []>} : vector<16x4xf32>, vector<4x32xf32>, vector<16x32xf32> -> vector<16x32xf32>
    %26 = vector.shape_cast %25 : vector<16x32xf32> to vector<2x8x32xf32>
    "tpu.trace_start"() <{level = 10 : i32, message = "bij,bjh->bih"}> : () -> ()
    %cst_24 = arith.constant dense<0.000000e+00> : vector<2x8x32xf32>
    %27 = tpu.matmul %23, %26, %cst_24 {dimension_numbers = #tpu.dot_dimension_numbers<[2], [1], [1], [2], [0, 0, 0, 1, 1, 2], [0], [0]>} : vector<2x8x8xf32>, vector<2x8x32xf32>, vector<2x8x32xf32> -> vector<2x8x32xf32>
    "tpu.trace_stop"() : () -> ()
    %28 = vector.shape_cast %1 : vector<1x32xf32> to vector<1x1x32xf32>
    %29 = vector.broadcast %28 : vector<1x1x32xf32> to vector<2x8x32xf32>
    %30 = arith.addf %27, %29 : vector<2x8x32xf32>
    %cst_25 = arith.constant 0.000000e+00 : f32
    %31 = vector.broadcast %cst_25 : f32 to vector<2x8x32xf32>
    %32 = arith.maximumf %30, %31 : vector<2x8x32xf32>
    %33 = vector.shape_cast %32 : vector<2x8x32xf32> to vector<16x32xf32>
    %cst_26 = arith.constant dense<0.000000e+00> : vector<16x16xf32>
    %34 = tpu.matmul %33, %2, %cst_26 {dimension_numbers = #tpu.dot_dimension_numbers<[1], [0], [0], [1], [0, 0, 1, 1], [], []>} : vector<16x32xf32>, vector<32x16xf32>, vector<16x16xf32> -> vector<16x16xf32>
    %35 = vector.shape_cast %34 : vector<16x16xf32> to vector<2x8x16xf32>
    "tpu.trace_start"() <{level = 10 : i32, message = "bij,bjc->bic"}> : () -> ()
    %cst_27 = arith.constant dense<0.000000e+00> : vector<2x8x16xf32>
    %36 = tpu.matmul %23, %35, %cst_27 {dimension_numbers = #tpu.dot_dimension_numbers<[2], [1], [1], [2], [0, 0, 0, 1, 1, 2], [0], [0]>} : vector<2x8x8xf32>, vector<2x8x16xf32>, vector<2x8x16xf32> -> vector<2x8x16xf32>
    "tpu.trace_stop"() : () -> ()
    %37 = vector.shape_cast %3 : vector<1x16xf32> to vector<1x1x16xf32>
    %38 = vector.broadcast %37 : vector<1x1x16xf32> to vector<2x8x16xf32>
    %39 = arith.addf %36, %38 : vector<2x8x16xf32>
    %40 = vector.extract_strided_slice %21 {offsets = [0, 0, 0], sizes = [2, 1, 16], strides = [1, 1, 1]} : vector<2x8x16xf32> to vector<2x1x16xf32>
    %41 = vector.shape_cast %40 : vector<2x1x16xf32> to vector<2x16xf32>
    %42 = vector.extract_strided_slice %21 {offsets = [0, 1, 0], sizes = [2, 1, 16], strides = [1, 1, 1]} : vector<2x8x16xf32> to vector<2x1x16xf32>
    %43 = vector.shape_cast %42 : vector<2x1x16xf32> to vector<2x16xf32>
    %44 = vector.extract_strided_slice %21 {offsets = [0, 2, 0], sizes = [2, 1, 16], strides = [1, 1, 1]} : vector<2x8x16xf32> to vector<2x1x16xf32>
    %45 = vector.shape_cast %44 : vector<2x1x16xf32> to vector<2x16xf32>
    %46 = vector.extract_strided_slice %21 {offsets = [0, 3, 0], sizes = [2, 1, 16], strides = [1, 1, 1]} : vector<2x8x16xf32> to vector<2x1x16xf32>
    %47 = vector.shape_cast %46 : vector<2x1x16xf32> to vector<2x16xf32>
    %48 = vector.extract_strided_slice %21 {offsets = [0, 4, 0], sizes = [2, 1, 16], strides = [1, 1, 1]} : vector<2x8x16xf32> to vector<2x1x16xf32>
    %49 = vector.shape_cast %48 : vector<2x1x16xf32> to vector<2x16xf32>
    %50 = vector.extract_strided_slice %21 {offsets = [0, 5, 0], sizes = [2, 1, 16], strides = [1, 1, 1]} : vector<2x8x16xf32> to vector<2x1x16xf32>
    %51 = vector.shape_cast %50 : vector<2x1x16xf32> to vector<2x16xf32>
    %52 = vector.extract_strided_slice %21 {offsets = [0, 6, 0], sizes = [2, 1, 16], strides = [1, 1, 1]} : vector<2x8x16xf32> to vector<2x1x16xf32>
    %53 = vector.shape_cast %52 : vector<2x1x16xf32> to vector<2x16xf32>
    %54 = vector.extract_strided_slice %21 {offsets = [0, 7, 0], sizes = [2, 1, 16], strides = [1, 1, 1]} : vector<2x8x16xf32> to vector<2x1x16xf32>
    %55 = vector.shape_cast %54 : vector<2x1x16xf32> to vector<2x16xf32>
    %56 = vector.extract_strided_slice %39 {offsets = [0, 0, 0], sizes = [2, 1, 16], strides = [1, 1, 1]} : vector<2x8x16xf32> to vector<2x1x16xf32>
    %57 = vector.shape_cast %56 : vector<2x1x16xf32> to vector<2x16xf32>
    %58 = vector.extract_strided_slice %39 {offsets = [0, 1, 0], sizes = [2, 1, 16], strides = [1, 1, 1]} : vector<2x8x16xf32> to vector<2x1x16xf32>
    %59 = vector.shape_cast %58 : vector<2x1x16xf32> to vector<2x16xf32>
    %60 = vector.extract_strided_slice %39 {offsets = [0, 2, 0], sizes = [2, 1, 16], strides = [1, 1, 1]} : vector<2x8x16xf32> to vector<2x1x16xf32>
    %61 = vector.shape_cast %60 : vector<2x1x16xf32> to vector<2x16xf32>
    %62 = vector.extract_strided_slice %39 {offsets = [0, 3, 0], sizes = [2, 1, 16], strides = [1, 1, 1]} : vector<2x8x16xf32> to vector<2x1x16xf32>
    %63 = vector.shape_cast %62 : vector<2x1x16xf32> to vector<2x16xf32>
    %64 = vector.extract_strided_slice %39 {offsets = [0, 4, 0], sizes = [2, 1, 16], strides = [1, 1, 1]} : vector<2x8x16xf32> to vector<2x1x16xf32>
    %65 = vector.shape_cast %64 : vector<2x1x16xf32> to vector<2x16xf32>
    %66 = vector.extract_strided_slice %39 {offsets = [0, 5, 0], sizes = [2, 1, 16], strides = [1, 1, 1]} : vector<2x8x16xf32> to vector<2x1x16xf32>
    %67 = vector.shape_cast %66 : vector<2x1x16xf32> to vector<2x16xf32>
    %68 = vector.extract_strided_slice %39 {offsets = [0, 6, 0], sizes = [2, 1, 16], strides = [1, 1, 1]} : vector<2x8x16xf32> to vector<2x1x16xf32>
    %69 = vector.shape_cast %68 : vector<2x1x16xf32> to vector<2x16xf32>
    %70 = vector.extract_strided_slice %39 {offsets = [0, 7, 0], sizes = [2, 1, 16], strides = [1, 1, 1]} : vector<2x8x16xf32> to vector<2x1x16xf32>
    %71 = vector.shape_cast %70 : vector<2x1x16xf32> to vector<2x16xf32>
    %72 = tpu.concatenate %41, %43, %45, %47, %49, %51, %53, %55, %57, %59, %61, %63, %65, %67, %69, %71 in 1 : vector<2x16xf32>, vector<2x16xf32>, vector<2x16xf32>, vector<2x16xf32>, vector<2x16xf32>, vector<2x16xf32>, vector<2x16xf32>, vector<2x16xf32>, vector<2x16xf32>, vector<2x16xf32>, vector<2x16xf32>, vector<2x16xf32>, vector<2x16xf32>, vector<2x16xf32>, vector<2x16xf32>, vector<2x16xf32> -> vector<2x256xf32>
    %c0_28 = arith.constant 0 : index
    %c0_29 = arith.constant 0 : index
    %73 = vector.load %arg8[%c0_28, %c0_29] : memref<256x360xf32, #tpu.memory_space<vmem>>, vector<256x360xf32>
    %cst_30 = arith.constant dense<0.000000e+00> : vector<2x360xf32>
    %74 = tpu.matmul %72, %73, %cst_30 {dimension_numbers = #tpu.dot_dimension_numbers<[1], [0], [0], [1], [0, 0, 1, 1], [], []>} : vector<2x256xf32>, vector<256x360xf32>, vector<2x360xf32> -> vector<2x360xf32>
    %c0_31 = arith.constant 0 : index
    %c0_32 = arith.constant 0 : index
    %75 = vector.load %arg9[%c0_31, %c0_32] : memref<1x360xf32, #tpu.memory_space<vmem>>, vector<1x360xf32>
    %76 = vector.broadcast %75 : vector<1x360xf32> to vector<2x360xf32>
    %77 = arith.addf %74, %76 : vector<2x360xf32>
    %cst_33 = arith.constant 0.000000e+00 : f32
    %78 = vector.broadcast %cst_33 : f32 to vector<2x360xf32>
    %79 = arith.maximumf %77, %78 : vector<2x360xf32>
    %c0_34 = arith.constant 0 : index
    %c0_35 = arith.constant 0 : index
    %80 = vector.load %arg10[%c0_34, %c0_35] : memref<360x256xf32, #tpu.memory_space<vmem>>, vector<360x256xf32>
    %cst_36 = arith.constant dense<0.000000e+00> : vector<2x256xf32>
    %81 = tpu.matmul %79, %80, %cst_36 {dimension_numbers = #tpu.dot_dimension_numbers<[1], [0], [0], [1], [0, 0, 1, 1], [], []>} : vector<2x360xf32>, vector<360x256xf32>, vector<2x256xf32> -> vector<2x256xf32>
    %c0_37 = arith.constant 0 : index
    %c0_38 = arith.constant 0 : index
    %82 = vector.load %arg11[%c0_37, %c0_38] : memref<1x256xf32, #tpu.memory_space<vmem>>, vector<1x256xf32>
    %83 = vector.broadcast %82 : vector<1x256xf32> to vector<2x256xf32>
    %84 = arith.addf %81, %83 : vector<2x256xf32>
    %cst_39 = arith.constant 0.000000e+00 : f32
    %85 = vector.broadcast %cst_39 : f32 to vector<2x256xf32>
    %86 = arith.maximumf %84, %85 : vector<2x256xf32>
    %c0_40 = arith.constant 0 : index
    %c0_41 = arith.constant 0 : index
    %87 = vector.load %arg12[%c0_40, %c0_41] : memref<256x128xf32, #tpu.memory_space<vmem>>, vector<256x128xf32>
    %cst_42 = arith.constant dense<0.000000e+00> : vector<2x128xf32>
    %88 = tpu.matmul %86, %87, %cst_42 {dimension_numbers = #tpu.dot_dimension_numbers<[1], [0], [0], [1], [0, 0, 1, 1], [], []>} : vector<2x256xf32>, vector<256x128xf32>, vector<2x128xf32> -> vector<2x128xf32>
    %c0_43 = arith.constant 0 : index
    %c0_44 = arith.constant 0 : index
    %89 = vector.load %arg13[%c0_43, %c0_44] : memref<1x128xf32, #tpu.memory_space<vmem>>, vector<1x128xf32>
    %90 = vector.broadcast %89 : vector<1x128xf32> to vector<2x128xf32>
    %91 = arith.addf %88, %90 : vector<2x128xf32>
    %cst_45 = arith.constant 0.000000e+00 : f32
    %92 = vector.broadcast %cst_45 : f32 to vector<2x128xf32>
    %93 = arith.maximumf %91, %92 : vector<2x128xf32>
    %c0_46 = arith.constant 0 : index
    %c0_47 = arith.constant 0 : index
    %94 = vector.load %arg14[%c0_46, %c0_47] : memref<128x1xf32, #tpu.memory_space<vmem>>, vector<128x1xf32>
    %cst_48 = arith.constant dense<0.000000e+00> : vector<2x1xf32>
    %95 = tpu.matmul %93, %94, %cst_48 {dimension_numbers = #tpu.dot_dimension_numbers<[1], [0], [0], [1], [0, 0, 1, 1], [], []>} : vector<2x128xf32>, vector<128x1xf32>, vector<2x1xf32> -> vector<2x1xf32>
    %c0_49 = arith.constant 0 : index
    %c0_50 = arith.constant 0 : index
    %96 = vector.load %arg15[%c0_49, %c0_50] : memref<1x1xf32, #tpu.memory_space<vmem>>, vector<1x1xf32>
    %97 = vector.broadcast %96 : vector<1x1xf32> to vector<2x1xf32>
    %98 = arith.addf %95, %97 : vector<2x1xf32>
    %c0_51 = arith.constant 0 : index
    %c0_52 = arith.constant 0 : index
    %99 = vector.load %arg16[%c0_51, %c0_52] : memref<2x1xf32, #tpu.memory_space<vmem>>, vector<2x1xf32>
    tpu.vector_store %arg16[%c0_51, %c0_52], %98 {strides = array<i32>} : memref<2x1xf32, #tpu.memory_space<vmem>>, vector<2x1xf32>,
    return
  }
}

</mosaic_0001>

<bundles_post_ra>
// kernel: my_new_gcn_forward.1
= control target key start
LH: loop header
LB: loop body
LE: loop exit
PB: predicated region body
PF: predicated region fallthrough
CT: control target
= control target key end

     0   :  { %vm73_vm0 = vcmask 1043456   ;;  %vm66_vm1 = vcmask 31744   ;;  %v2374_v3 = vmov 0.0   ;;  %vm2375_vm2 = vmmov 0   ;;  %s2377_s25 = smov 48   ;;  %s2382_s17 = smov 112   ;;  %s3359_s4 = inlined_call_operand.vmem [shape: f32[4,32], index: 4, kind: input, shape index: {}]   ;;  %s3360_s0 = inlined_call_operand.vmem [shape: f32[2,8,4], index: 0, kind: input, shape index: {}]   ;;  %s3361_s6 = inlined_call_operand.vmem [shape: f32[32,16], index: 6, kind: input, shape index: {}]   ;;  %s3362_s2 = inlined_call_operand.vmem [shape: f32[2,8,8], index: 2, kind: input, shape index: {}]   ;;  %s3363_s5 = inlined_call_operand.vmem [shape: f32[1,32], index: 5, kind: input, shape index: {}]   ;;  %s3364_s1 = inlined_call_operand.vmem [shape: f32[2,8,4], index: 1, kind: input, shape index: {}]   ;;  %s3365_s3 = inlined_call_operand.vmem [shape: f32[2,8,8], index: 3, kind: input, shape index: {}]   ;;  %s3366_s7 = inlined_call_operand.vmem [shape: f32[1,16], index: 7, kind: input, shape index: {}]   ;;  %s3367_s8 = inlined_call_operand.vmem [shape: f32[256,360], index: 8, kind: input, shape index: {}]   ;;  %s3368_s10 = inlined_call_operand.vmem [shape: f32[360,256], index: 10, kind: input, shape index: {}]   ;;  %s3369_s12 = inlined_call_operand.vmem [shape: f32[256,128], index: 12, kind: input, shape index: {}]   ;;  %s3370_s9 = inlined_call_operand.vmem [shape: f32[1,360], index: 9, kind: input, shape index: {}]   ;;  %s3371_s11 = inlined_call_operand.vmem [shape: f32[1,256], index: 11, kind: input, shape index: {}]   ;;  %s3372_s14 = inlined_call_operand.vmem [shape: f32[128,1], index: 14, kind: input, shape index: {}]   ;;  %s3373_s15 = inlined_call_operand.<no memory space> [shape: f32[1,1], index: 15, kind: input, shape index: {}]   ;;  %s3374_s13 = inlined_call_operand.vmem [shape: f32[1,128], index: 13, kind: input, shape index: {}]   ;;  %s3375_s16 = inlined_call_operand.vmem [shape: f32[2,1], index: 16, kind: output, shape index: {}]  }
   0x1   :  { %3376 = sst [smem:[#allocation3_spill]] %s3359_s4  ;;  %v62_v1 = vld [vmem:[%s3360_s0] sm:$0xff]  ;;  %v63_v2 = vld [vmem:[%s3360_s0 + $0x8] sm:$0xff]  ;;  %1972 = vmatprep.subr.mxu0 %v2374_v3  ;;  %1974 = vmatprep.mubr.msk.f32.mxu0 %vm2375_vm2, %v2374_v3  ;;  %vm158_vm3 = vcmask 64512   ;;  %v59_v11 = vld [vmem:[%s3361_s6 + $0x10] sm:$0xff]  ;;  %vm307_vm4 = vcmask 261120  }
   0x2   :  { %s3377_s23 = sld [smem:[#allocation3_spill]]  ;;  %1964 = vmatprep.mubr.msk.f32.mxu1 %vm66_vm1, %v62_v1  ;;  %v57_v4 = vld [vmem:[%s3361_s6] sm:$0xff]  ;;  %v58_v5 = vld [vmem:[%s3361_s6 + $0x8] sm:$0xff]  ;;  %v60_v12 = vld [vmem:[%s3361_s6 + $0x18] sm:$0xff]  ;;  %vm992_vm5 = vcmask 1041409   ;;  %s2376_s4 = smov 16  }
   0x3   :  { %v65_v6 = vld [vmem:[%s3362_s2 + $0x8] sm:$0xff]  ;;  %v2069_v7 = vpack.c.bf16 %v58_v5, %v57_v4  ;;  %v64_v9 = vld [vmem:[%s3362_s2] sm:$0xff]  ;;  %v2073_v13 = vpack.c.bf16 %v60_v12, %v59_v11  ;;  %v1105_v11 = vld [vmem:[%s3367_s8 + $0x18] sm:$0xff]  ;;  %vm1082_vm6 = vcmask 130048   ;;  %vm1085_vm7 = vcmask 392192  }
   0x4   :  { %v2515_v14 = vld [vmem:[%s3363_s5] ss:$0 sm:$0xff]  ;;  %v536_v24 = vld [vmem:[%s3364_s1 + $0x8] sm:$0xff]  ;;  %v1109_v12 = vld [vmem:[%s3367_s8 + $0x38] sm:$0xff]  ;;  %vm1087_vm8 = vcmask 523264   ;;  %vm1089_vm9 = vcmask 654336  }
   0x5   :  { %v535_v23 = vld [vmem:[%s3364_s1] sm:$0xff]  ;;  %v2538_v27 = vld [vmem:[%s3365_s3 + $0x8] sm:$0xff]  ;;  %s2378_s1 = smov 32   ;;  %vm1091_vm10 = vcmask 785408   ;;  %vm1093_vm11 = vcmask 916480   ;;  %vm1461_vm12 = vcmask 850944  }
   0x6   :  { %v537_v30 = vld [vmem:[%s3365_s3] sm:$0xff]  ;;  %vm1812_vm13 = vcmask 1024  }
   0x7   :  { %v2558_v31 = vld [vmem:[%s3366_s7] ss:$0 sm:$0xff]  ;;  %s2379_s7 = smov 64  }
   0x8   :  { %v55_v0 = vld [vmem:[%s3377_s23] sm:$0xf] }
   0x9   :  { %1962 = vmatprep.subr.msk.mxu1 %vm73_vm0, %v55_v0 }
   0xa   :  { %1963 = vmatpush3.msk.msra.mxu1 %vm73_vm0, %v55_v0 }
   0xb   :  { %1965 = vmatmul.mubr.msk.f32.vlgmr.msra.gmra.mrb[0].mxu1 %vm66_vm1, %v63_v2  ;;  %1967 = vmatprep.subr.mxu1 %v2374_v3 }
   0xc   :  { %1969 = vmatprep.mubr.msk.f32.mxu1 %vm2375_vm2, %v2374_v3 }
  0xde   :  { %v1966_v8 = vpop.f32.mrb[0].mxu1 }
  0xdf   :  { %v143_v10 = vpop.f32.mrb[1].mxu1  ;;  %1973 = vmatpush3.msra.mxu0 %v1966_v8  ;;  %v1106_v8 = vld [vmem:[%s3367_s8 + $0x20] sm:$0xff] }
  0xe0   :  { %1968 = vmatpush3.msra.mxu1 %v143_v10  ;;  %1975 = vmatmul.mubr.msk.f32.vlgmr.msra.gmra.mrb[0].mxu0 %vm158_vm3, %v65_v6 }
  0xe1   :  { %1970 = vmatmul.mubr.msk.f32.vlgmr.msra.gmra.mrb[2].mxu1 %vm158_vm3, %v64_v9  ;;  %2070 = vmatprep.subr.bf16.mxu1 %v2069_v7 }
  0xe2   :  { %2072 = vmatpush3.bf16.msra.mxu1 %v2069_v7  ;;  %1988 = vmatprep.subr.mxu0 %v2374_v3 }
  0xe3   :  { %1990 = vmatprep.mubr.msk.f32.mxu0 %vm2375_vm2, %v2374_v3  ;;  %2074 = vmatprep.subr.bf16.mxu1 %v2073_v13 }
  0xe6   :  { %2076 = vmatpush3.bf16.msra.mxu1 %v2073_v13 }
  0xe7   :  { %1998 = vmatprep.subr.msk.mxu1 %vm73_vm0, %v55_v0 }
 0x1b3   :  { %v301_v15 = vpop.f32.mrb[0].mxu0 }
 0x1b4   :  { %v228_v16 = vpop.f32.mrb[2].mxu1  ;;  %v302_v17 = vadd.f32 %v2515_v14, %v301_v15  ;;  %v1976_v18 = vpop.f32.mrb[1].mxu0 }
 0x1b5   :  { %v229_v19 = vadd.f32 %v2515_v14, %v228_v16  ;;  %v1971_v20 = vpop.f32.mrb[3].mxu1  ;;  %v1108_v16 = vld [vmem:[%s3367_s8 + $0x30] sm:$0xff]  ;;  %v1115_v18 = vld [vmem:[%s3367_s8 + $0x68] sm:$0xff] }
 0x1b6   :  { %v306_v21 = vmax.f32 %v302_v17, 0.0  ;;  %v1111_v17 = vld [vmem:[%s3367_s8 + $0x48] sm:$0xff] }
 0x1b7   :  { %v305_v22 = vmax.f32 %v229_v19, 0.0  ;;  %v1118_v19 = vld [vmem:[%s3367_s8 + $0x80] sm:$0xff]  ;;  %v2091_v20 = vpack.c.bf16 %v1111_v17, %v1108_v16  ;;  %v1125_v16 = vld [vmem:[%s3367_s8 + $0xb8] sm:$0xff] }
 0x1b8   :  { %v1145_v17 = vld [vmem:[%s3367_s8 + $0x158] sm:$0xff] }
 0x1b9   :  { %1985 = vmatprep.mubr.msk.f32.mxu1 %vm307_vm4, %v305_v22  ;;  %v1114_v22 = vld [vmem:[%s3367_s8 + $0x60] sm:$0xff] }
 0x1ba   :  { %1986 = vmatmul.mubr.msk.f32.vlgmr.msra.gmra.mrb[4].mxu1 %vm307_vm4, %v306_v21  ;;  %v2093_v21 = vpack.c.bf16 %v1118_v19, %v1115_v18  ;;  %v1148_v18 = vld [vmem:[%s3367_s8 + $0x170] sm:$0xff] }
 0x1bb   :  { %1999 = vmatpush3.msk.msra.mxu1 %vm73_vm0, %v55_v0  ;;  %2000 = vmatprep.mubr.msk.f32.mxu1 %vm66_vm1, %v535_v23  ;;  %v1117_v23 = vld [vmem:[%s3367_s8 + $0x78] sm:$0xff] }
 0x1bc   :  { %2008 = vmatprep.subr.mxu1 %v2374_v3 }
 0x1be   :  { %2001 = vmatmul.mubr.msk.f32.vlgmr.msra.gmra.mrb[6].mxu1 %vm66_vm1, %v536_v24  ;;  %v1121_v24 = vld [vmem:[%s3367_s8 + $0x98] sm:$0xff] }
 0x1bf   :  { %2010 = vmatprep.mubr.msk.f32.mxu1 %vm2375_vm2, %v2374_v3 }
 0x28d   :  { %v1987_v25 = vpop.f32.mrb[4].mxu1 }
 0x28e   :  { %v380_v26 = vpop.f32.mrb[5].mxu1 }
 0x28f   :  { %1989 = vmatpush3.msra.mxu0 %v380_v26  ;;  %v2095_v26 = vpack.c.bf16 %v1117_v23, %v1114_v22  ;;  %v1144_v22 = vld [vmem:[%s3367_s8 + $0x150] sm:$0xff]  ;;  %v1147_v23 = vld [vmem:[%s3367_s8 + $0x168] sm:$0xff] }
 0x290   :  { %1991 = vmatmul.mubr.msk.f32.vlgmr.msra.gmra.mrb[2].mxu0 %vm158_vm3, %v64_v9  ;;  %1993 = vmatprep.subr.mxu0 %v2374_v3  ;;  %v1102_v9 = vld [vmem:[%s3367_s8] sm:$0xff] }
 0x291   :  { %1994 = vmatpush3.msra.mxu0 %v1987_v25  ;;  %1995 = vmatprep.mubr.msk.f32.mxu0 %vm2375_vm2, %v2374_v3  ;;  %v2002_v28 = vpop.f32.mrb[6].mxu1  ;;  %v1124_v25 = vld [vmem:[%s3367_s8 + $0xb0] sm:$0xff] }
 0x292   :  { %v611_v29 = vpop.f32.mrb[7].mxu1  ;;  %2003 = vmatprep.subr.mxu0 %v2374_v3  ;;  %2009 = vmatpush3.msra.mxu1 %v2002_v28  ;;  %v1120_v28 = vld [vmem:[%s3367_s8 + $0x90] sm:$0xff] }
 0x293   :  { %2011 = vmatmul.mubr.msk.f32.vlgmr.msra.gmra.mrb[8].mxu1 %vm158_vm3, %v2538_v27  ;;  %2024 = vmatprep.subr.mxu1 %v2374_v3 }
 0x294   :  { %1996 = vmatmul.mubr.msk.f32.vlgmr.msra.gmra.mrb[4].mxu0 %vm158_vm3, %v65_v6  ;;  %2026 = vmatprep.mubr.msk.f32.mxu1 %vm2375_vm2, %v2374_v3 }
 0x295   :  { %2004 = vmatpush3.msra.mxu0 %v611_v29  ;;  %2005 = vmatprep.mubr.msk.f32.mxu0 %vm2375_vm2, %v2374_v3  ;;  %v1123_v29 = vld [vmem:[%s3367_s8 + $0xa8] sm:$0xff] }
 0x296   :  { %2078 = vmatprep.subr.bf16.mxu0 %v2069_v7 }
 0x298   :  { %2006 = vmatmul.mubr.msk.f32.vlgmr.msra.gmra.mrb[6].mxu0 %vm158_vm3, %v537_v30 }
 0x299   :  { %2080 = vmatpush3.bf16.msra.mxu0 %v2069_v7  ;;  %v1103_v7 = vld [vmem:[%s3367_s8 + $0x8] sm:$0xff] }
 0x29a   :  { %2082 = vmatprep.subr.bf16.mxu0 %v2073_v13  ;;  %v2085_v10 = vpack.c.bf16 %v1106_v8, %v1103_v7  ;;  %v1170_v7 = vld [vmem:[%s3367_s8 + $0x220] sm:$0xff]  ;;  %v1173_v8 = vld [vmem:[%s3367_s8 + $0x238] sm:$0xff] }
 0x29d   :  { %2084 = vmatpush3.bf16.msra.mxu0 %v2073_v13  ;;  %v1112_v13 = vld [vmem:[%s3367_s8 + $0x50] sm:$0xff] }
 0x29e   :  { %v2089_v15 = vpack.c.bf16 %v1112_v13, %v1109_v12  ;;  %2086 = vmatprep.subr.bf16.mxu0 %v2085_v10  ;;  %v1138_v10 = vld [vmem:[%s3367_s8 + $0x120] sm:$0xff]  ;;  %v1141_v13 = vld [vmem:[%s3367_s8 + $0x138] sm:$0xff] }
 0x29f   :  { %v2111_v19 = vpack.c.bf16 %v1141_v13, %v1138_v10  ;;  %v1182_v10 = vld [vmem:[%s3367_s8 + $0x280] sm:$0xff] }
 0x363   :  { %v461_v32 = vpop.f32.mrb[2].mxu0 }
 0x364   :  { %v462_v33 = vadd.f32 %v2558_v31, %v461_v32  ;;  %v1992_v34 = vpop.f32.mrb[3].mxu0  ;;  %v1130_v32 = vld [vmem:[%s3367_s8 + $0xe0] sm:$0xff] }
 0x365   :  { %v1155_v34 = vld [vmem:[%s3367_s8 + $0x1a8] sm:$0xff] }
 0x366   :  { %v762_v35 = vpop.f32.mrb[8].mxu1  ;;  %v995_v39 = vrot.slane %v462_v33, 1  ;;  %v1006_v42 = vrot.slane %v462_v33, 3  ;;  %v1000_v43 = vrot.slane %v462_v33, 2  ;;  %v1012_v44 = vrot.slane %v462_v33, 4 }
 0x367   :  { %v531_v36 = vpop.f32.mrb[4].mxu0  ;;  %v763_v37 = vadd.f32 %v2515_v14, %v762_v35  ;;  %v2012_v38 = vpop.f32.mrb[9].mxu1  ;;  %v1018_v46 = vrot.slane %v462_v33, 5  ;;  %v1024_v47 = vrot.slane %v462_v33, 6  ;;  %v1030_v48 = vrot.slane %v462_v33, 7 }
 0x368   :  { %v532_v40 = vadd.f32 %v2558_v31, %v531_v36  ;;  %v1997_v41 = vpop.f32.mrb[5].mxu0  ;;  %v2099_v35 = vpack.c.bf16 %v1123_v29, %v1120_v28  ;;  %v1126_v36 = vld [vmem:[%s3367_s8 + $0xc0] sm:$0xff]  ;;  %v1104_v38 = vld [vmem:[%s3367_s8 + $0x10] sm:$0xff]  ;;  %v1153_v29 = vld [vmem:[%s3367_s8 + $0x198] sm:$0xff] }
 0x369   :  { %v767_v45 = vmax.f32 %v763_v37, 0.0  ;;  %v1133_v41 = vld [vmem:[%s3367_s8 + $0xf8] sm:$0xff]  ;;  %v1150_v28 = vld [vmem:[%s3367_s8 + $0x180] sm:$0xff] }
 0x36a   :  { %v2564_v49 = vsel %vm992_vm5, %v532_v40, %v995_v39  ;;  %v1007_v50 = vrot.slane %v532_v40, 2  ;;  %v1001_v51 = vrot.slane %v532_v40, 1  ;;  %v1013_v52 = vrot.slane %v532_v40, 3 }
 0x36b   :  { %v689_v53 = vpop.f32.mrb[6].mxu0  ;;  %v1019_v54 = vrot.slane %v532_v40, 4  ;;  %v1025_v55 = vrot.slane %v532_v40, 5  ;;  %v1031_v56 = vrot.slane %v532_v40, 6  ;;  %v991_v57 = vrot.slane %v532_v40, 7  ;;  %v1129_v40 = vld [vmem:[%s3367_s8 + $0xd8] sm:$0xff] }
 0x36c   :  { %v690_v58 = vadd.f32 %v2515_v14, %v689_v53  ;;  %v2007_v59 = vpop.f32.mrb[7].mxu0  ;;  %v2568_v60 = vsel %vm992_vm5, %v1007_v50, %v1006_v42  ;;  %v2571_v61 = vsel %vm992_vm5, %v1001_v51, %v1000_v43  ;;  %v2574_v62 = vsel %vm992_vm5, %v1013_v52, %v1012_v44  ;;  %v1107_v42 = vld [vmem:[%s3367_s8 + $0x28] sm:$0xff]  ;;  %v1136_v43 = vld [vmem:[%s3367_s8 + $0x110] sm:$0xff]  ;;  %v1113_v50 = vld [vmem:[%s3367_s8 + $0x58] sm:$0xff] }
 0x36d   :  { %v2577_v63 = vsel %vm992_vm5, %v1019_v54, %v1018_v46  ;;  %v2580_v0 = vsel %vm992_vm5, %v1025_v55, %v1024_v47  ;;  %v2583_v1 = vsel %vm992_vm5, %v1031_v56, %v1030_v48  ;;  %v2586_v2 = vsel %vm992_vm5, %v991_v57, %v462_v33  ;;  %v1152_v33 = vld [vmem:[%s3367_s8 + $0x190] sm:$0xff]  ;;  %v1161_v46 = vld [vmem:[%s3367_s8 + $0x1d8] sm:$0xff]  ;;  %v1110_v48 = vld [vmem:[%s3367_s8 + $0x40] sm:$0xff] }
 0x36e   :  { %v766_v4 = vmax.f32 %v690_v58, 0.0  ;;  %v2087_v14 = vpack.c.bf16 %v1105_v11, %v1102_v9  ;;  %v2149_v37 = vpack.c.bf16 %v1155_v34, %v1152_v33  ;;  %v2151_v44 = vpack.c.bf16 %v1107_v42, %v1104_v38  ;;  %v1132_v52 = vld [vmem:[%s3367_s8 + $0xf0] sm:$0xff]  ;;  %v1135_v56 = vld [vmem:[%s3367_s8 + $0x108] sm:$0xff]  ;;  %v1142_v59 = vld [vmem:[%s3367_s8 + $0x140] sm:$0xff] }
 0x36f   :  { %v2103_v51 = vpack.c.bf16 %v1129_v40, %v1126_v36  ;;  %v2155_v53 = vpack.c.bf16 %v1113_v50, %v1110_v48  ;;  %v1164_v54 = vld [vmem:[%s3367_s8 + $0x1f0] sm:$0xff]  ;;  %v2105_v55 = vpack.c.bf16 %v1136_v43, %v1133_v41  ;;  %v1139_v57 = vld [vmem:[%s3367_s8 + $0x128] sm:$0xff]  ;;  %v2107_v9 = vpack.c.bf16 %v1135_v56, %v1132_v52  ;;  %v1166_v38 = vld [vmem:[%s3367_s8 + $0x200] sm:$0xff] }
 0x370   :  { %2021 = vmatprep.mubr.msk.f32.mxu0 %vm307_vm4, %v766_v4  ;;  %v1167_v58 = vld [vmem:[%s3367_s8 + $0x208] sm:$0xff]  ;;  %v2109_v12 = vpack.c.bf16 %v1142_v59, %v1139_v57  ;;  %v2119_v33 = vpack.c.bf16 %v1153_v29, %v1150_v28  ;;  %v1162_v41 = vld [vmem:[%s3367_s8 + $0x1e0] sm:$0xff]  ;;  %v1165_v42 = vld [vmem:[%s3367_s8 + $0x1f8] sm:$0xff] }
 0x371   :  { %2022 = vmatmul.mubr.msk.f32.vlgmr.msra.gmra.mrb[8].mxu0 %vm307_vm4, %v767_v45  ;;  %v1158_v45 = vld [vmem:[%s3367_s8 + $0x1c0] sm:$0xff]  ;;  %v2157_v4 = vpack.c.bf16 %v1167_v58, %v1164_v54  ;;  %v1159_v36 = vld [vmem:[%s3367_s8 + $0x1c8] sm:$0xff]  ;;  %v1169_v43 = vld [vmem:[%s3367_s8 + $0x218] sm:$0xff] }
 0x372   :  { %2088 = vmatpush1.bf16.msra.mxu0 %v2087_v14  ;;  %v2153_v47 = vpack.c.bf16 %v1161_v46, %v1158_v45  ;;  %v2161_v14 = vpack.c.bf16 %v1173_v8, %v1170_v7  ;;  %v2127_v45 = vpack.c.bf16 %v1165_v42, %v1162_v41  ;;  %v1171_v48 = vld [vmem:[%s3367_s8 + $0x228] sm:$0xff]  ;;  %v1178_v52 = vld [vmem:[%s3367_s8 + $0x260] sm:$0xff]  ;;  %v1177_v57 = vld [vmem:[%s3367_s8 + $0x258] sm:$0xff] }
 0x373   :  { %2090 = vmatprep.subr.bf16.mxu0 %v2089_v15  ;;  %v1122_v15 = vld [vmem:[%s3367_s8 + $0xa0] sm:$0xff]  ;;  %v1181_v8 = vld [vmem:[%s3367_s8 + $0x278] sm:$0xff] }
 0x374   :  { %v1174_v56 = vld [vmem:[%s3367_s8 + $0x240] sm:$0xff] }
 0x375   :  { %v2135_v59 = vpack.c.bf16 %v1177_v57, %v1174_v56 }
 0x376   :  { %2092 = vmatpush1.bf16.msra.mxu0 %v2091_v20  ;;  %v2163_v20 = vpack.c.bf16 %v1125_v16, %v1122_v15  ;;  %v1180_v15 = vld [vmem:[%s3367_s8 + $0x270] sm:$0xff]  ;;  %v1183_v16 = vld [vmem:[%s3367_s8 + $0x288] sm:$0xff] }
 0x377   :  { %2094 = vmatprep.subr.bf16.mxu0 %v2093_v21  ;;  %v2113_v21 = vpack.c.bf16 %v1148_v18, %v1145_v17  ;;  %v2139_v18 = vpack.c.bf16 %v1183_v16, %v1180_v15 }
 0x37a   :  { %2096 = vmatpush1.bf16.msra.mxu0 %v2095_v26  ;;  %v2115_v26 = vpack.c.bf16 %v1147_v23, %v1144_v22 }
 0x444   :  { %v2023_v5 = vpop.f32.mrb[8].mxu0 }
 0x445   :  { %v840_v6 = vpop.f32.mrb[9].mxu0 }
 0x446   :  { %2025 = vmatpush3.msra.mxu1 %v840_v6  ;;  %v1119_v6 = vld [vmem:[%s3367_s8 + $0x88] sm:$0xff] }
 0x447   :  { %2027 = vmatmul.mubr.msk.f32.vlgmr.msra.gmra.mrb[10].mxu1 %vm158_vm3, %v537_v30  ;;  %2029 = vmatprep.subr.mxu1 %v2374_v3  ;;  %v1127_v30 = vld [vmem:[%s3367_s8 + $0xc8] sm:$0xff] }
 0x448   :  { %2030 = vmatpush3.msra.mxu1 %v2023_v5  ;;  %2031 = vmatprep.mubr.msk.f32.mxu1 %vm2375_vm2, %v2374_v3  ;;  %v2101_v39 = vpack.c.bf16 %v1130_v32, %v1127_v30  ;;  %v1116_v5 = vld [vmem:[%s3367_s8 + $0x70] sm:$0xff]  ;;  %v1157_v30 = vld [vmem:[%s3367_s8 + $0x1b8] sm:$0xff] }
 0x449   :  { %2150 = vmatprep.subr.bf16.mxu1 %v2149_v37  ;;  %v2159_v11 = vpack.c.bf16 %v1119_v6, %v1116_v5  ;;  %v1160_v32 = vld [vmem:[%s3367_s8 + $0x1d0] sm:$0xff]  ;;  %v1163_v37 = vld [vmem:[%s3367_s8 + $0x1e8] sm:$0xff] }
 0x44a   :  { %v2121_v34 = vpack.c.bf16 %v1160_v32, %v1157_v30  ;;  %v2125_v40 = vpack.c.bf16 %v1166_v38, %v1163_v37  ;;  %v1131_v5 = vld [vmem:[%s3367_s8 + $0xe8] sm:$0xff] }
 0x44b   :  { %2032 = vmatmul.mubr.msk.f32.vlgmr.msra.gmra.mrb[12].mxu1 %vm158_vm3, %v2538_v27  ;;  %v2097_v27 = vpack.c.bf16 %v1124_v25, %v1121_v24  ;;  %v1151_v24 = vld [vmem:[%s3367_s8 + $0x188] sm:$0xff]  ;;  %v1154_v25 = vld [vmem:[%s3367_s8 + $0x1a0] sm:$0xff] }
 0x44c   :  { %2152 = vmatpush3.bf16.msra.mxu1 %v2151_v44  ;;  %v1172_v44 = vld [vmem:[%s3367_s8 + $0x230] sm:$0xff] }
 0x44d   :  { %2098 = vmatprep.subr.bf16.mxu0 %v2097_v27  ;;  %2154 = vmatprep.subr.bf16.mxu1 %v2153_v47  ;;  %v2117_v27 = vpack.c.bf16 %v1154_v25, %v1151_v24  ;;  %v2129_v46 = vpack.c.bf16 %v1172_v44, %v1169_v43  ;;  %v1168_v47 = vld [vmem:[%s3367_s8 + $0x210] sm:$0xff]  ;;  %v1187_v25 = vld [vmem:[%s3367_s8 + $0x2a8] sm:$0xff] }
 0x44e   :  { %2100 = vmatpush1.bf16.msra.mxu0 %v2099_v35  ;;  %v1156_v35 = vld [vmem:[%s3367_s8 + $0x1b0] sm:$0xff]  ;;  %v2131_v50 = vpack.c.bf16 %v1171_v48, %v1168_v47  ;;  %v1189_v47 = vld [vmem:[%s3367_s8 + $0x2b8] sm:$0xff] }
 0x44f   :  { %2102 = vmatprep.subr.bf16.mxu0 %v2101_v39  ;;  %v2123_v39 = vpack.c.bf16 %v1159_v36, %v1156_v35 }
 0x450   :  { %2156 = vmatpush3.bf16.msra.mxu1 %v2155_v53  ;;  %v1176_v53 = vld [vmem:[%s3367_s8 + $0x250] sm:$0xff] }
 0x451   :  { %2158 = vmatprep.subr.bf16.mxu1 %v2157_v4  ;;  %v1128_v4 = vld [vmem:[%s3367_s8 + $0xd0] sm:$0xff] }
 0x452   :  { %2104 = vmatpush1.bf16.msra.mxu0 %v2103_v51  ;;  %v1175_v51 = vld [vmem:[%s3367_s8 + $0x248] sm:$0xff]  ;;  %v2167_v6 = vpack.c.bf16 %v1131_v5, %v1128_v4  ;;  %v1194_v4 = vld [vmem:[%s3367_s8 + $0x2e0] sm:$0xff]  ;;  %v1197_v5 = vld [vmem:[%s3367_s8 + $0x2f8] sm:$0xff] }
 0x453   :  { %2106 = vmatprep.subr.bf16.mxu0 %v2105_v55  ;;  %v2133_v54 = vpack.c.bf16 %v1178_v52, %v1175_v51  ;;  %v1179_v55 = vld [vmem:[%s3367_s8 + $0x268] sm:$0xff]  ;;  %v1140_v52 = vld [vmem:[%s3367_s8 + $0x130] sm:$0xff]  ;;  %v2177_v15 = vpack.c.bf16 %v1197_v5, %v1194_v4 }
 0x454   :  { %2160 = vmatpush3.bf16.msra.mxu1 %v2159_v11  ;;  %v2165_v58 = vpack.c.bf16 %v1179_v55, %v1176_v53  ;;  %v1143_v53 = vld [vmem:[%s3367_s8 + $0x148] sm:$0xff]  ;;  %v1365_v4 = vld [vmem:[%s3368_s10 + $0x30] sm:$0xff] }
 0x455   :  { %2162 = vmatprep.subr.bf16.mxu1 %v2161_v14  ;;  %v1185_v14 = vld [vmem:[%s3367_s8 + $0x298] sm:$0xff]  ;;  %v1368_v5 = vld [vmem:[%s3368_s10 + $0x48] sm:$0xff] }
 0x456   :  { %2108 = vmatpush1.bf16.msra.mxu0 %v2107_v9  ;;  %v1184_v9 = vld [vmem:[%s3367_s8 + $0x290] sm:$0xff]  ;;  %v2169_v17 = vpack.c.bf16 %v1185_v14, %v1182_v10 }
 0x457   :  { %2110 = vmatprep.subr.bf16.mxu0 %v2109_v12  ;;  %v2137_v13 = vpack.c.bf16 %v1184_v9, %v1181_v8  ;;  %v1195_v8 = vld [vmem:[%s3367_s8 + $0x2e8] sm:$0xff] }
 0x458   :  { %2164 = vmatpush3.bf16.msra.mxu1 %v2163_v20  ;;  %v1137_v20 = vld [vmem:[%s3367_s8 + $0x118] sm:$0xff] }
 0x459   :  { %2166 = vmatprep.subr.bf16.mxu1 %v2165_v58 }
 0x45a   :  { %2112 = vmatpush1.bf16.msra.mxu0 %v2111_v19  ;;  %v1134_v19 = vld [vmem:[%s3367_s8 + $0x100] sm:$0xff] }
 0x45b   :  { %2114 = vmatprep.subr.bf16.mxu0 %v2113_v21  ;;  %v2171_v24 = vpack.c.bf16 %v1137_v20, %v1134_v19 }
 0x45c   :  { %2168 = vmatpush3.bf16.msra.mxu1 %v2167_v6 }
 0x45d   :  { %2170 = vmatprep.subr.bf16.mxu1 %v2169_v17 }
 0x45e   :  { %2116 = vmatpush1.bf16.msra.mxu0 %v2115_v26  ;;  %v1190_v26 = vld [vmem:[%s3367_s8 + $0x2c0] sm:$0xff] }
 0x45f   :  { %2118 = vmatprep.subr.bf16.mxu0 %v2117_v27 }
 0x460   :  { %2172 = vmatpush3.bf16.msra.mxu1 %v2171_v24 }
 0x462   :  { %2120 = vmatpush1.bf16.msra.mxu0 %v2119_v33  ;;  %v1188_v33 = vld [vmem:[%s3367_s8 + $0x2b0] sm:$0xff] }
 0x463   :  { %2122 = vmatprep.subr.bf16.mxu0 %v2121_v34  ;;  %v1191_v34 = vld [vmem:[%s3367_s8 + $0x2c8] sm:$0xff] }
 0x464   :  { %v2173_v37 = vpack.c.bf16 %v1191_v34, %v1188_v33 }
 0x466   :  { %2124 = vmatpush1.bf16.msra.mxu0 %v2123_v39  ;;  %2174 = vmatprep.subr.bf16.mxu1 %v2173_v37 }
 0x467   :  { %2126 = vmatprep.subr.bf16.mxu0 %v2125_v40 }
 0x46a   :  { %2128 = vmatpush1.bf16.msra.mxu0 %v2127_v45 }
 0x46b   :  { %2130 = vmatprep.subr.bf16.mxu0 %v2129_v46  ;;  %v1186_v46 = vld [vmem:[%s3367_s8 + $0x2a0] sm:$0xff] }
 0x46c   :  { %v2143_v10 = vpack.c.bf16 %v1189_v47, %v1186_v46  ;;  %v1359_v46 = vld [vmem:[%s3368_s10] sm:$0xff]  ;;  %v1361_v47 = vld [vmem:[%s3368_s10 + $0x10] sm:$0xff] }
 0x46e   :  { %2132 = vmatpush1.bf16.msra.mxu0 %v2131_v50 }
 0x46f   :  { %2134 = vmatprep.subr.bf16.mxu0 %v2133_v54  ;;  %v1193_v54 = vld [vmem:[%s3367_s8 + $0x2d8] sm:$0xff] }
 0x472   :  { %2136 = vmatpush1.bf16.msra.mxu0 %v2135_v59  ;;  %v1196_v59 = vld [vmem:[%s3367_s8 + $0x2f0] sm:$0xff] }
 0x473   :  { %2138 = vmatprep.subr.bf16.mxu0 %v2137_v13  ;;  %v1149_v13 = vld [vmem:[%s3367_s8 + $0x178] sm:$0xff]  ;;  %v2145_v14 = vpack.c.bf16 %v1196_v59, %v1193_v54  ;;  %v1363_v59 = vld [vmem:[%s3368_s10 + $0x20] sm:$0xff] }
 0x476   :  { %2140 = vmatpush1.bf16.msra.mxu0 %v2139_v18 }
 0x51a   :  { %v915_v7 = vpop.f32.mrb[10].mxu1 }
 0x51b   :  { %v2822_v11 = vadd.f32 %v2558_v31, %v915_v7  ;;  %v2028_v12 = vpop.f32.mrb[11].mxu1  ;;  %v1192_v7 = vld [vmem:[%s3367_s8 + $0x2d0] sm:$0xff] }
 0x51c   :  { %v2175_v12 = vpack.c.bf16 %v1143_v53, %v1140_v52  ;;  %v2147_v16 = vpack.c.bf16 %v1195_v8, %v1192_v7  ;;  %v1369_v7 = vld [vmem:[%s3368_s10 + $0x50] sm:$0xff]  ;;  %v1372_v8 = vld [vmem:[%s3368_s10 + $0x68] sm:$0xff] }
 0x51d   :  { %v1041_v22 = vrot.slane %v2822_v11, 1  ;;  %v1052_v23 = vrot.slane %v2822_v11, 3  ;;  %v1046_v29 = vrot.slane %v2822_v11, 2  ;;  %v1058_v30 = vrot.slane %v2822_v11, 4 }
 0x51e   :  { %v985_v21 = vpop.f32.mrb[12].mxu1  ;;  %v1064_v32 = vrot.slane %v2822_v11, 5  ;;  %v1070_v35 = vrot.slane %v2822_v11, 6  ;;  %v1076_v36 = vrot.slane %v2822_v11, 7  ;;  %2176 = vmatpush3.bf16.msra.mxu1 %v2175_v12  ;;  %v1371_v12 = vld [vmem:[%s3368_s10 + $0x60] sm:$0xff] }
 0x51f   :  { %v986_v27 = vadd.f32 %v2558_v31, %v985_v21  ;;  %v2033_v28 = vpop.f32.mrb[13].mxu1  ;;  %v2141_v31 = vpack.c.bf16 %v1190_v26, %v1187_v25  ;;  %2178 = vmatprep.subr.bf16.mxu1 %v2177_v15 }
 0x521   :  { %v1042_v38 = vsel %vm992_vm5, %v986_v27, %v1041_v22  ;;  %v1053_v39 = vrot.slane %v986_v27, 2  ;;  %v1047_v40 = vrot.slane %v986_v27, 1  ;;  %v1059_v41 = vrot.slane %v986_v27, 3  ;;  %2142 = vmatprep.subr.bf16.mxu0 %v2141_v31 }
 0x522   :  { %v2339_v42 = vpack.i.bf16 %v2564_v49, %v1042_v38  ;;  %v1065_v43 = vrot.slane %v986_v27, 4  ;;  %v1071_v44 = vrot.slane %v986_v27, 5  ;;  %v1077_v45 = vrot.slane %v986_v27, 6  ;;  %2144 = vmatpush1.bf16.msra.mxu0 %v2143_v10 }
 0x523   :  { %v1054_v48 = vsel %vm992_vm5, %v1053_v39, %v1052_v23  ;;  %v1048_v50 = vsel %vm992_vm5, %v1047_v40, %v1046_v29  ;;  %v1060_v51 = vsel %vm992_vm5, %v1059_v41, %v1058_v30  ;;  %v1038_v49 = vrot.slane %v986_v27, 7  ;;  %2146 = vmatprep.subr.bf16.mxu0 %v2145_v14  ;;  %v1378_v14 = vld [vmem:[%s3368_s10 + $0x98] sm:$0xff] }
 0x524   :  { %2340 = vrot.lane.b32.xlu0 %v2339_v42, %s2376_s4  ;;  %v2349_v55 = vpack.i.bf16 %v2568_v60, %v1054_v48  ;;  %v2344_v56 = vpack.i.bf16 %v2571_v61, %v1048_v50  ;;  %v2354_v57 = vpack.i.bf16 %v2574_v62, %v1060_v51  ;;  %v1066_v58 = vsel %vm992_vm5, %v1065_v43, %v1064_v32  ;;  %s2381_s4 = smov 96   ;;  %v1364_v50 = vld [vmem:[%s3368_s10 + $0x28] sm:$0xff]  ;;  %v1366_v51 = vld [vmem:[%s3368_s10 + $0x38] sm:$0xff] }
 0x525   :  { %v2359_v60 = vpack.i.bf16 %v2577_v63, %v1066_v58  ;;  %v1072_v61 = vsel %vm992_vm5, %v1071_v44, %v1070_v35  ;;  %v1078_v62 = vsel %vm992_vm5, %v1077_v45, %v1076_v36  ;;  %v1039_v6 = vsel %vm992_vm5, %v1038_v49, %v2822_v11  ;;  %v1146_v11 = vld [vmem:[%s3367_s8 + $0x160] sm:$0xff]  ;;  %s2380_s8 = smov 80  }
 0x526   :  { %2350 = vrot.lane.b32.xlu1 %v2349_v55, %s2377_s25  ;;  %v2364_v9 = vpack.i.bf16 %v2580_v0, %v1072_v61  ;;  %v2369_v63 = vpack.i.bf16 %v2583_v1, %v1078_v62  ;;  %v1360_v0 = vld [vmem:[%s3368_s10 + $0x8] sm:$0xff]  ;;  %v1362_v1 = vld [vmem:[%s3368_s10 + $0x18] sm:$0xff]  ;;  %v2179_v17 = vpack.c.bf16 %v1149_v13, %v1146_v11  ;;  %2148 = vmatpush1.bf16.msra.mxu0 %v2147_v16  ;;  %v1373_v11 = vld [vmem:[%s3368_s10 + $0x70] sm:$0xff] }
 0x527   :  { %v2181_v18 = vpack.c.bf16 %v1362_v1, %v1360_v0  ;;  %v2183_v55 = vpack.c.bf16 %v1361_v47, %v1359_v46  ;;  %v2185_v58 = vpack.c.bf16 %v1366_v51, %v1364_v50  ;;  %v2187_v61 = vpack.c.bf16 %v1365_v4, %v1363_v59  ;;  %v1376_v13 = vld [vmem:[%s3368_s10 + $0x88] sm:$0xff]  ;;  %v1375_v0 = vld [vmem:[%s3368_s10 + $0x80] sm:$0xff]  ;;  %v1377_v1 = vld [vmem:[%s3368_s10 + $0x90] sm:$0xff] }
 0x528   :  { %2345 = vrot.lane.b32.xlu0 %v2344_v56, %s2378_s1  ;;  %2180 = vmatpush3.bf16.msra.mxu1 %v2179_v17  ;;  %v2195_v15 = vpack.c.bf16 %v1373_v11, %v1371_v12  ;;  %v2197_v16 = vpack.c.bf16 %v1378_v14, %v1376_v13  ;;  %v1380_v17 = vld [vmem:[%s3368_s10 + $0xa8] sm:$0xff]  ;;  %v1402_v47 = vld [vmem:[%s3368_s10 + $0x158] sm:$0xff]  ;;  %v1399_v51 = vld [vmem:[%s3368_s10 + $0x140] sm:$0xff] }
 0x529   :  { %2182 = vmatprep.subr.bf16.mxu1 %v2181_v18  ;;  %v1382_v18 = vld [vmem:[%s3368_s10 + $0xb8] sm:$0xff]  ;;  %v1400_v46 = vld [vmem:[%s3368_s10 + $0x148] sm:$0xff]  ;;  %v1415_v14 = vld [vmem:[%s3368_s10 + $0x1c0] sm:$0xff] }
 0x52a   :  { %2355 = vrot.lane.b32.xlu1 %v2354_v57, %s2379_s7  ;;  %v2221_v50 = vpack.c.bf16 %v1402_v47, %v1400_v46  ;;  %v1410_v59 = vld [vmem:[%s3368_s10 + $0x198] sm:$0xff]  ;;  %v1633_v46 = vld [vmem:[%s3369_s12 + $0xc0] sm:$0xff]  ;;  %v1634_v47 = vld [vmem:[%s3369_s12 + $0xc8] sm:$0xff] }
 0x52b   :  { %v1418_v12 = vld [vmem:[%s3368_s10 + $0x1d8] sm:$0xff] }
 0x52c   :  { %2360 = vrot.lane.b32.xlu0 %v2359_v60, %s2380_s8  ;;  %v1370_v60 = vld [vmem:[%s3368_s10 + $0x58] sm:$0xff] }
 0x52d   :  { %v2189_v62 = vpack.c.bf16 %v1370_v60, %v1368_v5  ;;  %v1407_v60 = vld [vmem:[%s3368_s10 + $0x180] sm:$0xff] }
 0x52e   :  { %2365 = vrot.lane.b32.xlu1 %v2364_v9, %s2381_s4  ;;  %v1374_v9 = vld [vmem:[%s3368_s10 + $0x78] sm:$0xff] }
 0x52f   :  { %v2193_v10 = vpack.c.bf16 %v1374_v9, %v1372_v8  ;;  %v1411_v9 = vld [vmem:[%s3368_s10 + $0x1a0] sm:$0xff] }
 0x530   :  { %2370 = vrot.lane.b32.xlu0 %v2369_v63, %s2382_s17 }
 0x596   :  { %v2341_v19 = vpop.permute.xlu0 %2340 }
 0x597   :  { %v2343_v20 = vunpack.i.h.bf16 %v2341_v19  ;;  %v2342_v21 = vunpack.i.l.bf16 %v2341_v19  ;;  %v2199_v19 = vpack.c.bf16 %v1377_v1, %v1375_v0  ;;  %v1420_v0 = vld [vmem:[%s3368_s10 + $0x1e8] sm:$0xff]  ;;  %v1422_v1 = vld [vmem:[%s3368_s10 + $0x1f8] sm:$0xff] }
 0x598   :  { %v2351_v22 = vpop.permute.xlu1 %2350 }
 0x599   :  { %v1083_v26 = vsel %vm1082_vm6, %v2586_v2, %v2343_v20  ;;  %v1095_v27 = vsel %vm1082_vm6, %v1039_v6, %v2342_v21  ;;  %v2353_v28 = vunpack.i.h.bf16 %v2351_v22  ;;  %v2352_v29 = vunpack.i.l.bf16 %v2351_v22  ;;  %v1367_v6 = vld [vmem:[%s3368_s10 + $0x40] sm:$0xff]  ;;  %v1381_v22 = vld [vmem:[%s3368_s10 + $0xb0] sm:$0xff] }
 0x59a   :  { %v2346_v23 = vpop.permute.xlu0 %2345  ;;  %v2191_v63 = vpack.c.bf16 %v1369_v7, %v1367_v6  ;;  %v2201_v20 = vpack.c.bf16 %v1382_v18, %v1380_v17  ;;  %v1379_v21 = vld [vmem:[%s3368_s10 + $0xa0] sm:$0xff]  ;;  %v1414_v6 = vld [vmem:[%s3368_s10 + $0x1b8] sm:$0xff]  ;;  %v2241_v17 = vpack.c.bf16 %v1422_v1, %v1420_v0  ;;  %v1428_v1 = vld [vmem:[%s3368_s10 + $0x228] sm:$0xff] }
 0x59b   :  { %v2348_v24 = vunpack.i.h.bf16 %v2346_v23  ;;  %v2347_v25 = vunpack.i.l.bf16 %v2346_v23  ;;  %v1384_v23 = vld [vmem:[%s3368_s10 + $0xc8] sm:$0xff]  ;;  %v1419_v18 = vld [vmem:[%s3368_s10 + $0x1e0] sm:$0xff] }
 0x59c   :  { %v2356_v30 = vpop.permute.xlu1 %2355 }
 0x59d   :  { %v1084_v32 = vsel %vm307_vm4, %v1083_v26, %v2348_v24  ;;  %v1096_v33 = vsel %vm307_vm4, %v1095_v27, %v2347_v25  ;;  %v2358_v34 = vunpack.i.h.bf16 %v2356_v30  ;;  %v2357_v35 = vunpack.i.l.bf16 %v2356_v30  ;;  %v1386_v24 = vld [vmem:[%s3368_s10 + $0xd8] sm:$0xff]  ;;  %v1383_v27 = vld [vmem:[%s3368_s10 + $0xc0] sm:$0xff] }
 0x59e   :  { %v1086_v36 = vsel %vm1085_vm7, %v1084_v32, %v2353_v28  ;;  %v1097_v31 = vsel %vm1085_vm7, %v1096_v33, %v2352_v29  ;;  %v2361_v37 = vpop.permute.xlu0 %2360  ;;  %v2203_v25 = vpack.c.bf16 %v1381_v22, %v1379_v21  ;;  %v2205_v26 = vpack.c.bf16 %v1386_v24, %v1384_v23  ;;  %v1385_v28 = vld [vmem:[%s3368_s10 + $0xd0] sm:$0xff]  ;;  %v1388_v29 = vld [vmem:[%s3368_s10 + $0xe8] sm:$0xff]  ;;  %v1390_v30 = vld [vmem:[%s3368_s10 + $0xf8] sm:$0xff] }
 0x59f   :  { %v1088_v38 = vsel %vm1087_vm8, %v1086_v36, %v2358_v34  ;;  %v1098_v39 = vsel %vm1087_vm8, %v1097_v31, %v2357_v35  ;;  %v2363_v40 = vunpack.i.h.bf16 %v2361_v37  ;;  %v2362_v41 = vunpack.i.l.bf16 %v2361_v37  ;;  %v1387_v34 = vld [vmem:[%s3368_s10 + $0xe0] sm:$0xff]  ;;  %v1389_v35 = vld [vmem:[%s3368_s10 + $0xf0] sm:$0xff]  ;;  %v1392_v36 = vld [vmem:[%s3368_s10 + $0x108] sm:$0xff] }
 0x5a0   :  { %v2366_v2 = vpop.permute.xlu1 %2365  ;;  %v2207_v32 = vpack.c.bf16 %v1385_v28, %v1383_v27  ;;  %v2209_v33 = vpack.c.bf16 %v1390_v30, %v1388_v29  ;;  %v1394_v31 = vld [vmem:[%s3368_s10 + $0x118] sm:$0xff]  ;;  %v2211_v37 = vpack.c.bf16 %v1389_v35, %v1387_v34  ;;  %v1424_v21 = vld [vmem:[%s3368_s10 + $0x208] sm:$0xff]  ;;  %v1625_v24 = vld [vmem:[%s3369_s12 + $0x80] sm:$0xff] }
 0x5a1   :  { %v1090_v42 = vsel %vm1089_vm9, %v1088_v38, %v2363_v40  ;;  %v2368_v43 = vunpack.i.h.bf16 %v2366_v2  ;;  %v2367_v44 = vunpack.i.l.bf16 %v2366_v2  ;;  %v1099_v45 = vsel %vm1089_vm9, %v1098_v39, %v2362_v41  ;;  %v1391_v39 = vld [vmem:[%s3368_s10 + $0x100] sm:$0xff]  ;;  %v1393_v40 = vld [vmem:[%s3368_s10 + $0x110] sm:$0xff]  ;;  %v1396_v41 = vld [vmem:[%s3368_s10 + $0x128] sm:$0xff] }
 0x5a2   :  { %v2371_v48 = vpop.permute.xlu0 %2370  ;;  %v2213_v38 = vpack.c.bf16 %v1394_v31, %v1392_v36  ;;  %v1398_v2 = vld [vmem:[%s3368_s10 + $0x138] sm:$0xff]  ;;  %v1610_v28 = vld [vmem:[%s3369_s12 + $0x8] sm:$0xff]  ;;  %v1627_v29 = vld [vmem:[%s3369_s12 + $0x90] sm:$0xff] }
 0x5a3   :  { %v1092_v49 = vsel %vm1091_vm10, %v1090_v42, %v2368_v43  ;;  %v2373_v52 = vunpack.i.h.bf16 %v2371_v48  ;;  %v2372_v53 = vunpack.i.l.bf16 %v2371_v48  ;;  %v1100_v54 = vsel %vm1091_vm10, %v1099_v45, %v2367_v44  ;;  %v1395_v44 = vld [vmem:[%s3368_s10 + $0x120] sm:$0xff]  ;;  %v1397_v45 = vld [vmem:[%s3368_s10 + $0x130] sm:$0xff]  ;;  %v1426_v22 = vld [vmem:[%s3368_s10 + $0x218] sm:$0xff] }
 0x5a4   :  { %v2215_v42 = vpack.c.bf16 %v1393_v40, %v1391_v39  ;;  %v2217_v43 = vpack.c.bf16 %v1398_v2, %v1396_v41  ;;  %v2219_v48 = vpack.c.bf16 %v1397_v45, %v1395_v44  ;;  %v2245_v23 = vpack.c.bf16 %v1426_v22, %v1424_v21  ;;  %v1628_v30 = vld [vmem:[%s3369_s12 + $0x98] sm:$0xff]  ;;  %v1611_v34 = vld [vmem:[%s3369_s12 + $0x10] sm:$0xff]  ;;  %v1629_v36 = vld [vmem:[%s3369_s12 + $0xa0] sm:$0xff] }
 0x5a5   :  { %v1101_v56 = vsel %vm1093_vm11, %v1100_v54, %v2372_v53  ;;  %v1094_v57 = vsel %vm1093_vm11, %v1092_v49, %v2373_v52  ;;  %v1401_v49 = vld [vmem:[%s3368_s10 + $0x150] sm:$0xff]  ;;  %v1404_v52 = vld [vmem:[%s3368_s10 + $0x168] sm:$0xff]  ;;  %v1406_v53 = vld [vmem:[%s3368_s10 + $0x178] sm:$0xff] }
 0x5a6   :  { %1279 = vmatprep.mubr.f32.mxu0 %v1101_v56  ;;  %1350 = vmatprep.mubr.f32.mxu1 %v1101_v56  ;;  %v2223_v54 = vpack.c.bf16 %v1401_v49, %v1399_v51  ;;  %v1403_v56 = vld [vmem:[%s3368_s10 + $0x160] sm:$0xff]  ;;  %v1612_v35 = vld [vmem:[%s3369_s12 + $0x18] sm:$0xff]  ;;  %v1630_v31 = vld [vmem:[%s3369_s12 + $0xa8] sm:$0xff] }
 0x5a7   :  { %1280 = vmatmul.mubr.f32.vlgmr.msra.gmra.mrb[10].mxu0 %v1094_v57  ;;  %1351 = vmatmul.mubr.f32.vlgmr.msra.gmra.mrb[14].mxu1 %v1094_v57  ;;  %v1405_v57 = vld [vmem:[%s3368_s10 + $0x170] sm:$0xff]  ;;  %v1613_v39 = vld [vmem:[%s3369_s12 + $0x20] sm:$0xff]  ;;  %v1614_v40 = vld [vmem:[%s3369_s12 + $0x28] sm:$0xff] }
 0x5a8   :  { %2184 = vmatpush1.bf16.msra.mxu1 %v2183_v55  ;;  %v2225_v55 = vpack.c.bf16 %v1406_v53, %v1404_v52  ;;  %v2227_v4 = vpack.c.bf16 %v1405_v57, %v1403_v56  ;;  %v1631_v41 = vld [vmem:[%s3369_s12 + $0xb0] sm:$0xff]  ;;  %v1632_v2 = vld [vmem:[%s3369_s12 + $0xb8] sm:$0xff]  ;;  %v1617_v51 = vld [vmem:[%s3369_s12 + $0x40] sm:$0xff] }
 0x5a9   :  { %2186 = vmatprep.subr.bf16.mxu1 %v2185_v58  ;;  %v1408_v58 = vld [vmem:[%s3368_s10 + $0x188] sm:$0xff]  ;;  %v1615_v44 = vld [vmem:[%s3369_s12 + $0x30] sm:$0xff]  ;;  %v1616_v45 = vld [vmem:[%s3369_s12 + $0x38] sm:$0xff] }
 0x5aa   :  { %v2229_v5 = vpack.c.bf16 %v1410_v59, %v1408_v58  ;;  %v1618_v49 = vld [vmem:[%s3369_s12 + $0x48] sm:$0xff]  ;;  %v1635_v52 = vld [vmem:[%s3369_s12 + $0xd0] sm:$0xff]  ;;  %v1636_v53 = vld [vmem:[%s3369_s12 + $0xd8] sm:$0xff] }
 0x5ab   :  { %v1619_v56 = vld [vmem:[%s3369_s12 + $0x50] sm:$0xff]  ;;  %v1620_v57 = vld [vmem:[%s3369_s12 + $0x58] sm:$0xff]  ;;  %v1637_v58 = vld [vmem:[%s3369_s12 + $0xe0] sm:$0xff] }
 0x5ac   :  { %2188 = vmatpush1.bf16.msra.mxu1 %v2187_v61  ;;  %v1409_v61 = vld [vmem:[%s3368_s10 + $0x190] sm:$0xff]  ;;  %v1638_v59 = vld [vmem:[%s3369_s12 + $0xe8] sm:$0xff]  ;;  %v1427_v22 = vld [vmem:[%s3368_s10 + $0x220] sm:$0xff] }
 0x5ad   :  { %2190 = vmatprep.subr.bf16.mxu1 %v2189_v62  ;;  %v1412_v62 = vld [vmem:[%s3368_s10 + $0x1a8] sm:$0xff]  ;;  %v2231_v7 = vpack.c.bf16 %v1409_v61, %v1407_v60  ;;  %v1200_v60 = vlaneseq }
 0x5ae   :  { %v2233_v8 = vpack.c.bf16 %v1414_v6, %v1412_v62  ;;  %v1198_v6 = vld [vmem:[%s3370_s9] sm:$0x7] }
 0x5af   :  { %v3190_v61 = vshrl.u32 %v1200_v60, 7 }
 0x5b0   :  { %2192 = vmatpush1.bf16.msra.mxu1 %v2191_v63  ;;  %v1413_v63 = vld [vmem:[%s3368_s10 + $0x1b0] sm:$0xff] }
 0x5b1   :  { %2194 = vmatprep.subr.bf16.mxu1 %v2193_v10  ;;  %v1416_v10 = vld [vmem:[%s3368_s10 + $0x1c8] sm:$0xff]  ;;  %v2235_v11 = vpack.c.bf16 %v1413_v63, %v1411_v9  ;;  %v1202_v62 = vsub.s32 0, %v3190_v61 }
 0x5b2   :  { %v2237_v13 = vpack.c.bf16 %v1418_v12, %v1416_v10 }
 0x5b4   :  { %2196 = vmatpush1.bf16.msra.mxu1 %v2195_v15  ;;  %v1417_v15 = vld [vmem:[%s3368_s10 + $0x1d0] sm:$0xff] }
 0x5b5   :  { %2198 = vmatprep.subr.bf16.mxu1 %v2197_v16  ;;  %v2239_v16 = vpack.c.bf16 %v1417_v15, %v1415_v14  ;;  %v1423_v14 = vld [vmem:[%s3368_s10 + $0x200] sm:$0xff]  ;;  %v1425_v15 = vld [vmem:[%s3368_s10 + $0x210] sm:$0xff] }
 0x5b8   :  { %2200 = vmatpush1.bf16.msra.mxu1 %v2199_v19  ;;  %v1421_v19 = vld [vmem:[%s3368_s10 + $0x1f0] sm:$0xff] }
 0x5b9   :  { %2202 = vmatprep.subr.bf16.mxu1 %v2201_v20  ;;  %v2243_v20 = vpack.c.bf16 %v1421_v19, %v1419_v18  ;;  %v2247_v19 = vpack.c.bf16 %v1425_v15, %v1423_v14  ;;  %v1720_v14 = vld [vmem:[%s3372_s14 + $0x8] sm:$0xff] }
 0x5bc   :  { %2204 = vmatpush1.bf16.msra.mxu1 %v2203_v25  ;;  %v1626_v25 = vld [vmem:[%s3369_s12 + $0x88] sm:$0xff] }
 0x5bd   :  { %2206 = vmatprep.subr.bf16.mxu1 %v2205_v26  ;;  %v1609_v26 = vld [vmem:[%s3369_s12] sm:$0xff]  ;;  %v2269_v27 = vpack.c.bf16 %v1626_v25, %v1625_v24  ;;  %v1432_v24 = vld [vmem:[%s3368_s10 + $0x248] sm:$0xff]  ;;  %v1434_v25 = vld [vmem:[%s3368_s10 + $0x258] sm:$0xff] }
 0x5bf   :  { %2270 = vmatprep.subr.bf16.mxu0 %v2269_v27  ;;  %v2253_v27 = vpack.c.bf16 %v1434_v25, %v1432_v24  ;;  %v1729_v25 = vld [vmem:[%s3372_s14 + $0x50] sm:$0xff] }
 0x5c0   :  { %2208 = vmatpush1.bf16.msra.mxu1 %v2207_v32  ;;  %v2271_v32 = vpack.c.bf16 %v1610_v28, %v1609_v26  ;;  %v1431_v28 = vld [vmem:[%s3368_s10 + $0x240] sm:$0xff] }
 0x5c1   :  { %2210 = vmatprep.subr.bf16.mxu1 %v2209_v33  ;;  %v2273_v33 = vpack.c.bf16 %v1628_v30, %v1627_v29  ;;  %v1433_v29 = vld [vmem:[%s3368_s10 + $0x250] sm:$0xff]  ;;  %v1436_v30 = vld [vmem:[%s3368_s10 + $0x268] sm:$0xff] }
 0x5c2   :  { %2272 = vmatpush3.bf16.msra.mxu0 %v2271_v32  ;;  %v1438_v32 = vld [vmem:[%s3368_s10 + $0x278] sm:$0xff] }
 0x5c3   :  { %2274 = vmatprep.subr.bf16.mxu0 %v2273_v33  ;;  %v2255_v33 = vpack.c.bf16 %v1433_v29, %v1431_v28  ;;  %v1731_v28 = vld [vmem:[%s3372_s14 + $0x60] sm:$0xff]  ;;  %v1732_v29 = vld [vmem:[%s3372_s14 + $0x68] sm:$0xff] }
 0x5c4   :  { %2212 = vmatpush1.bf16.msra.mxu1 %v2211_v37  ;;  %v2275_v37 = vpack.c.bf16 %v1612_v35, %v1611_v34  ;;  %v2257_v34 = vpack.c.bf16 %v1438_v32, %v1436_v30  ;;  %v1435_v35 = vld [vmem:[%s3368_s10 + $0x260] sm:$0xff]  ;;  %v2320_v30 = vpack.c.bf16 %v1732_v29, %v1731_v28  ;;  %v1733_v32 = vld [vmem:[%s3372_s14 + $0x70] sm:$0xff] }
 0x5c5   :  { %2214 = vmatprep.subr.bf16.mxu1 %v2213_v38  ;;  %v2277_v38 = vpack.c.bf16 %v1630_v31, %v1629_v36  ;;  %v1437_v36 = vld [vmem:[%s3368_s10 + $0x270] sm:$0xff]  ;;  %v1440_v31 = vld [vmem:[%s3368_s10 + $0x288] sm:$0xff] }
 0x5c6   :  { %2276 = vmatpush3.bf16.msra.mxu0 %v2275_v37  ;;  %v1442_v37 = vld [vmem:[%s3368_s10 + $0x298] sm:$0xff] }
 0x5c7   :  { %2278 = vmatprep.subr.bf16.mxu0 %v2277_v38  ;;  %v2259_v38 = vpack.c.bf16 %v1437_v36, %v1435_v35  ;;  %v21_v35 = vstv %s3373_s15 }
 0x5c8   :  { %2216 = vmatpush1.bf16.msra.mxu1 %v2215_v42  ;;  %v2279_v42 = vpack.c.bf16 %v1614_v40, %v1613_v39  ;;  %v2261_v39 = vpack.c.bf16 %v1442_v37, %v1440_v31  ;;  %v1439_v40 = vld [vmem:[%s3368_s10 + $0x280] sm:$0xff]  ;;  %22 = vst [vmem:[#allocation2] sm:$0x1] %v21_v35 }
 0x5c9   :  { %2218 = vmatprep.subr.bf16.mxu1 %v2217_v43  ;;  %v2281_v43 = vpack.c.bf16 %v1632_v2, %v1631_v41  ;;  %v1441_v41 = vld [vmem:[%s3368_s10 + $0x290] sm:$0xff]  ;;  %v1444_v2 = vld [vmem:[%s3368_s10 + $0x2a8] sm:$0xff]  ;;  %v1839_v31 = vld [vmem:[%s3374_s13] ss:$0 sm:$0xff] }
 0x5ca   :  { %2280 = vmatpush3.bf16.msra.mxu0 %v2279_v42  ;;  %v1446_v42 = vld [vmem:[%s3368_s10 + $0x2b8] sm:$0xff] }
 0x5cb   :  { %2282 = vmatprep.subr.bf16.mxu0 %v2281_v43  ;;  %v1210_v43 = vsub.s32 2, %v3190_v61 }
 0x5cc   :  { %2220 = vmatpush1.bf16.msra.mxu1 %v2219_v48  ;;  %v2283_v48 = vpack.c.bf16 %v1616_v45, %v1615_v44  ;;  %v2263_v44 = vpack.c.bf16 %v1441_v41, %v1439_v40  ;;  %v2265_v45 = vpack.c.bf16 %v1446_v42, %v1444_v2 }
 0x5cd   :  { %2222 = vmatprep.subr.bf16.mxu1 %v2221_v50  ;;  %v2285_v50 = vpack.c.bf16 %v1634_v47, %v1633_v46  ;;  %v1443_v46 = vld [vmem:[%s3368_s10 + $0x2a0] sm:$0xff]  ;;  %v1445_v47 = vld [vmem:[%s3368_s10 + $0x2b0] sm:$0xff] }
 0x5ce   :  { %2284 = vmatpush3.bf16.msra.mxu0 %v2283_v48  ;;  %v1211_v48 = vrot.slane %v1198_v6, %v1210_v43 }
 0x5cf   :  { %2286 = vmatprep.subr.bf16.mxu0 %v2285_v50  ;;  %v2267_v50 = vpack.c.bf16 %v1445_v47, %v1443_v46  ;;  %v1840_v41 = vld [vmem:[#allocation2] ss:$0 sm:$0xff] }
 0x5d0   :  { %2224 = vmatpush1.bf16.msra.mxu1 %v2223_v54  ;;  %v2287_v54 = vpack.c.bf16 %v1618_v49, %v1617_v51  ;;  %v1448_v51 = vld [vmem:[%s3368_s10 + $0x2c8] sm:$0xff] }
 0x5d1   :  { %2226 = vmatprep.subr.bf16.mxu1 %v2225_v55  ;;  %v2289_v55 = vpack.c.bf16 %v1636_v53, %v1635_v52  ;;  %v1447_v52 = vld [vmem:[%s3368_s10 + $0x2c0] sm:$0xff] }
 0x5d2   :  { %2288 = vmatpush3.bf16.msra.mxu0 %v2287_v54  ;;  %v1621_v54 = vld [vmem:[%s3369_s12 + $0x60] sm:$0xff] }
 0x5d3   :  { %2290 = vmatprep.subr.bf16.mxu0 %v2289_v55  ;;  %v1622_v55 = vld [vmem:[%s3369_s12 + $0x68] sm:$0xff] }
 0x5d4   :  { %2228 = vmatpush1.bf16.msra.mxu1 %v2227_v4  ;;  %v2291_v4 = vpack.c.bf16 %v1620_v57, %v1619_v56  ;;  %v2295_v56 = vpack.c.bf16 %v1622_v55, %v1621_v54  ;;  %v1639_v57 = vld [vmem:[%s3369_s12 + $0xf0] sm:$0xff] }
 0x5d5   :  { %2230 = vmatprep.subr.bf16.mxu1 %v2229_v5  ;;  %v2293_v5 = vpack.c.bf16 %v1638_v59, %v1637_v58  ;;  %v1640_v58 = vld [vmem:[%s3369_s12 + $0xf8] sm:$0xff] }
 0x5d6   :  { %2292 = vmatpush3.bf16.msra.mxu0 %v2291_v4  ;;  %v2297_v59 = vpack.c.bf16 %v1640_v58, %v1639_v57  ;;  %v1623_v4 = vld [vmem:[%s3369_s12 + $0x70] sm:$0xff] }
 0x5d7   :  { %2294 = vmatprep.subr.bf16.mxu0 %v2293_v5  ;;  %v1624_v5 = vld [vmem:[%s3369_s12 + $0x78] sm:$0xff] }
 0x5d8   :  { %2232 = vmatpush1.bf16.msra.mxu1 %v2231_v7  ;;  %v1206_v7 = vsub.s32 1, %v3190_v61  ;;  %v2299_v60 = vpack.c.bf16 %v1624_v5, %v1623_v4  ;;  %v1721_v61 = vld [vmem:[%s3372_s14 + $0x10] sm:$0xff] }
 0x5d9   :  { %2234 = vmatprep.subr.bf16.mxu1 %v2233_v8  ;;  %v1203_v8 = vrot.slane %v1198_v6, %v1202_v62 }
 0x5da   :  { %v1207_v9 = vrot.slane %v1198_v6, %v1206_v7  ;;  %2296 = vmatpush3.bf16.msra.mxu0 %v2295_v56  ;;  %v2383_v6 = vmov 0.0|0.0  }
 0x5db   :  { %2298 = vmatprep.subr.bf16.mxu0 %v2297_v59 }
 0x5dc   :  { %2236 = vmatpush1.bf16.msra.mxu1 %v2235_v11 }
 0x5dd   :  { %2238 = vmatprep.subr.bf16.mxu1 %v2237_v13 }
 0x5de   :  { %2300 = vmatpush3.bf16.msra.mxu0 %v2299_v60 }
 0x5df   :  { %2301 = vmatprep.subr.bf16.mxu0 %v2383_v6 }
 0x5e0   :  { %2240 = vmatpush1.bf16.msra.mxu1 %v2239_v16 }
 0x5e1   :  { %2242 = vmatprep.subr.bf16.mxu1 %v2241_v17  ;;  %v1430_v17 = vld [vmem:[%s3368_s10 + $0x238] sm:$0xff] }
 0x5e2   :  { %v2249_v21 = vpack.c.bf16 %v1430_v17, %v1428_v1  ;;  %v1723_v17 = vld [vmem:[%s3372_s14 + $0x20] sm:$0xff] }
 0x5e4   :  { %2244 = vmatpush1.bf16.msra.mxu1 %v2243_v20 }
 0x5e5   :  { %2246 = vmatprep.subr.bf16.mxu1 %v2245_v23  ;;  %v1429_v23 = vld [vmem:[%s3368_s10 + $0x230] sm:$0xff] }
 0x5e6   :  { %v2251_v26 = vpack.c.bf16 %v1429_v23, %v1427_v22  ;;  %v1727_v22 = vld [vmem:[%s3372_s14 + $0x40] sm:$0xff]  ;;  %v1728_v23 = vld [vmem:[%s3372_s14 + $0x48] sm:$0xff] }
 0x5e7   :  { %v2314_v24 = vpack.c.bf16 %v1728_v23, %v1727_v22 }
 0x67a   :  { %v1281_v63 = vpop.f32.mrb[10].mxu0  ;;  %v1907_v10 = vpop.f32.mrb[14].mxu1 }
 0x67b   :  { %v1282_v12 = vadd.f32 %v1281_v63, %v1203_v8  ;;  %v1283_v11 = vpop.f32.mrb[11].mxu0  ;;  %v1908_v13 = vpop.f32.mrb[15].mxu1  ;;  %v1449_v8 = vld [vmem:[%s3371_s11] sm:$0x3] }
 0x67c   :  { %v1284_v16 = vadd.f32 %v1283_v11, %v1207_v9  ;;  %v1909_v0 = vadd.f32 %v1908_v13, %v1907_v10  ;;  %v1454_v9 = vrot.slane %v1449_v8, %v1202_v62  ;;  %v1458_v63 = vrot.slane %v1449_v8, %v1206_v7  ;;  %v1719_v13 = vld [vmem:[%s3372_s14] sm:$0xff]  ;;  %v1722_v62 = vld [vmem:[%s3372_s14 + $0x18] sm:$0xff] }
 0x67d   :  { %v1356_v20 = vmax.f32 %v1282_v12, 0.0  ;;  %v2305_v7 = vpack.c.bf16 %v1722_v62, %v1721_v61 }
 0x67e   :  { %v1357_v18 = vmax.f32 %v1284_v16, 0.0  ;;  %v1353_v49 = vadd.f32 %v1909_v0, %v1211_v48  ;;  %v2302_v0 = vpack.c.bf16 %v1720_v14, %v1719_v13 }
 0x680   :  { %1529 = vmatprep.mubr.f32.mxu1 %v1357_v18  ;;  %v1358_v53 = vmax.f32 %v1353_v49, 0.0  ;;  %v1724_v18 = vld [vmem:[%s3372_s14 + $0x28] sm:$0xff] }
 0x681   :  { %1530 = vmatmul.mubr.f32.vlgmr.msra.gmra.mrb[16].mxu1 %v1356_v20  ;;  %v1725_v20 = vld [vmem:[%s3372_s14 + $0x30] sm:$0xff] }
 0x682   :  { %2248 = vmatpush1.bf16.msra.mxu1 %v2247_v19  ;;  %1600 = vmatprep.mubr.f32.mxu1 %v2374_v3  ;;  %v2308_v19 = vpack.c.bf16 %v1724_v18, %v1723_v17 }
 0x683   :  { %2250 = vmatprep.subr.bf16.mxu1 %v2249_v21 }
 0x686   :  { %2252 = vmatpush1.bf16.msra.mxu1 %v2251_v26  ;;  %v1730_v26 = vld [vmem:[%s3372_s14 + $0x58] sm:$0xff] }
 0x687   :  { %2254 = vmatprep.subr.bf16.mxu1 %v2253_v27  ;;  %v2317_v27 = vpack.c.bf16 %v1730_v26, %v1729_v25 }
 0x68a   :  { %2256 = vmatpush1.bf16.msra.mxu1 %v2255_v33  ;;  %v1734_v33 = vld [vmem:[%s3372_s14 + $0x78] sm:$0xff] }
 0x68b   :  { %2258 = vmatprep.subr.bf16.mxu1 %v2257_v34  ;;  %v2323_v34 = vpack.c.bf16 %v1734_v33, %v1733_v32 }
 0x68e   :  { %2260 = vmatpush1.bf16.msra.mxu1 %v2259_v38 }
 0x68f   :  { %2262 = vmatprep.subr.bf16.mxu1 %v2261_v39 }
 0x692   :  { %2264 = vmatpush1.bf16.msra.mxu1 %v2263_v44 }
 0x693   :  { %2266 = vmatprep.subr.bf16.mxu1 %v2265_v45 }
 0x696   :  { %2268 = vmatpush1.bf16.msra.mxu1 %v2267_v50 }
 0x697   :  { %1560 = vmatprep.subr.mxu1 %v1448_v51 }
 0x69a   :  { %1561 = vmatpush1.msra.mxu1 %v1447_v52 }
 0x69b   :  { %1838 = vmatmul.mubr.msk.f32.vlgmr.msra.gmra.mrb[16].mxu1 %vm1461_vm12, %v1358_v53 }
 0x76e   :  { %v1602_v10 = vpop.f32.mrb[16].mxu1 }
 0x76f   :  { %v2325_v12 = vadd.f32 %v1602_v10, %v1454_v9  ;;  %v1604_v11 = vpop.f32.mrb[17].mxu1 }
 0x770   :  { %v2326_v15 = vadd.f32 %v1604_v11, %v1458_v63 }
 0x771   :  { %v1607_v1 = vmax.f32 %v2325_v12, 0.0 }
 0x772   :  { %v1608_v16 = vmax.f32 %v2326_v15, 0.0 }
 0x774   :  { %1712 = vmatprep.mubr.f32.mxu0 %v1608_v16 }
 0x775   :  { %1713 = vmatmul.mubr.f32.vlgmr.msra.gmra.mrb[12].mxu0 %v1607_v1 }
 0x776   :  { %2303 = vmatpush3.bf16.msra.mxu0 %v2302_v0  ;;  %2066 = vmatprep.mubr.msk.f32.mxu0 %vm2375_vm2, %v2374_v3  ;;  %v1726_v3 = vld [vmem:[%s3372_s14 + $0x38] sm:$0xff] }
 0x777   :  { %2304 = vmatprep.subr.bf16.mxu0 %v2383_v6  ;;  %v2311_v21 = vpack.c.bf16 %v1726_v3, %v1725_v20 }
 0x77a   :  { %2306 = vmatpush3.bf16.msra.mxu0 %v2305_v7 }
 0x77b   :  { %2307 = vmatprep.subr.bf16.mxu0 %v2383_v6 }
 0x77e   :  { %2309 = vmatpush3.bf16.msra.mxu0 %v2308_v19 }
 0x77f   :  { %2310 = vmatprep.subr.bf16.mxu0 %v2383_v6 }
 0x782   :  { %2312 = vmatpush3.bf16.msra.mxu0 %v2311_v21 }
 0x783   :  { %2313 = vmatprep.subr.bf16.mxu0 %v2383_v6 }
 0x786   :  { %2315 = vmatpush3.bf16.msra.mxu0 %v2314_v24 }
 0x787   :  { %2316 = vmatprep.subr.bf16.mxu0 %v2383_v6 }
 0x78a   :  { %2318 = vmatpush3.bf16.msra.mxu0 %v2317_v27 }
 0x78b   :  { %2319 = vmatprep.subr.bf16.mxu0 %v2383_v6 }
 0x78e   :  { %2321 = vmatpush3.bf16.msra.mxu0 %v2320_v30 }
 0x78f   :  { %2322 = vmatprep.subr.bf16.mxu0 %v2383_v6 }
 0x792   :  { %2324 = vmatpush3.bf16.msra.mxu0 %v2323_v34 }
 0x848   :  { %v1942_v36 = vpop.f32.mrb[12].mxu0 }
 0x849   :  { %v1943_v37 = vpop.f32.mrb[13].mxu0 }
 0x84a   :  { %v1944_v38 = vadd.f32 %v1943_v37, %v1942_v36 }
 0x84c   :  { %v1715_v39 = vadd.f32 %v1944_v38, %v1839_v31 }
 0x84e   :  { %v1718_v40 = vmax.f32 %v1715_v39, 0.0 }
 0x850   :  { %2067 = vmatmul.mubr.f32.vlgmr.msra.gmra.mrb[14].mxu0 %v1718_v40 }
 0x923   :  { %v1808_v2 = vpop.f32.mrb[14].mxu0 }
 0x924   :  { %v1809_v42 = vadd.f32 %v1840_v41, %v1808_v2  ;;  %v2068_v43 = vpop.f32.mrb[15].mxu0 }
 0x926   :  { %1813 = vst.msk [vmem:[%s3375_s16] sm:$0x3] %vm1812_vm13, %v1809_v42 }

</bundles_post_ra>
